<compile_context>
chip_gen: v7x
topology: tpu7x:2x2x1
jax: 0.10.0
libtpu: 0.0.40
codegen_flags: <defaults>
</compile_context>

<pallas_src>
import functools

import jax
import jax.numpy as jnp
from jax import lax
from jax.experimental import pallas as pl
from jax.experimental.pallas import tpu as pltpu

# ----- small, deterministic hyper-parameters (consistent with Mamba2.__init__) -----
D_MODEL   = 32
EXPAND    = 2
D_STATE   = 16
D_CONV    = 4
N_GROUPS  = 2
HEAD_DIM  = 16
CHUNK     = 8            # chunk_size; seq_len <= chunk_size -> single-chunk SSD is exact
RMS_EPS   = 1e-5

D_INNER    = D_MODEL * EXPAND                                # 64
NHEADS     = D_INNER // HEAD_DIM                             # 4
D_IN_PROJ  = 2 * D_INNER + 2 * N_GROUPS * D_STATE + NHEADS   # 196
CONV_DIM   = D_INNER + 2 * N_GROUPS * D_STATE                # 128
GROUP_SZ   = D_INNER // N_GROUPS                             # 32 (RMSNormGroup group size)
HPG        = NHEADS // N_GROUPS                              # heads per SSM group
W_MAIN_DIM = CONV_DIM + D_INNER                              # 192 : [xBC | z] columns
PACK       = 128 // D_MODEL                                  # rows packed per 128-lane out row
_ROWS_TARGET = 256                                           # target rows per grid step
_MAX_SPB     = 16                                            # cap static SSD-loop unrolling


def _softplus(x):
    return jnp.where(x > 20.0, x, jnp.log1p(jnp.exp(jnp.minimum(x, 20.0))))


def _silu(x):
    return x * (1.0 / (1.0 + jnp.exp(-x)))


# --------------------------------------------------------------------------- #
#                                Pallas kernel                                #
# --------------------------------------------------------------------------- #
def mamba2_kernel(hid_ref, w_main_ref, w_dt_ref, conv_w_ref, conv_b_ref,
                  A_ref, dtb_ref, norm_w_ref, d_ref, w_out_ref, out_ref,
                  *, seq_len, exp_dtype):
    R    = hid_ref.shape[0]                      # rows in this block = seq_per_block * seq_len
    spb  = R // seq_len
    f32  = jnp.float32
    bf16 = jnp.bfloat16

    hid = hid_ref[...]                                                     # (R, 32) f32

    # ---------------- in_proj: [xBC | z] in bf16 (f32 accum); dt columns in f32 ----------------
    zx  = jnp.dot(hid.astype(bf16), w_main_ref[...],
                  preferred_element_type=f32)                              # (R, 192)
    xBC = zx[:, :CONV_DIM]                                                 # (R, 128)
    z   = zx[:, CONV_DIM:]                                                 # (R, 64)
    dt_raw = jnp.dot(hid, w_dt_ref[...], preferred_element_type=f32)      # (R, 4) f32 path

    # ------- causal depthwise conv1d + bias + SiLU (taps via sublane roll + pos mask) -------
    pos = lax.broadcasted_iota(jnp.int32, (R, 1), 0) % seq_len             # position in sequence
    conv = conv_b_ref[...] + xBC * conv_w_ref[D_CONV - 1:D_CONV, :]
    for j in range(1, D_CONV):
        tap = pltpu.roll(xBC, shift=j, axis=0)                             # tap[t] = xBC[t - j]
        tap = jnp.where(pos >= j, tap, 0.0)                                # zero initial conv state
        conv = conv + tap * conv_w_ref[D_CONV - 1 - j:D_CONV - j, :]
    conv = _silu(conv)

    x_all = conv[:, :D_INNER]                                              # (R, 64)
    B_all = conv[:, D_INNER:D_INNER + N_GROUPS * D_STATE]                  # (R, 32)
    C_all = conv[:, D_INNER + N_GROUPS * D_STATE:]                         # (R, 32)

    # -------- dt, dt*A, segmented log-step prefix scan (VPU/XLU only, no (R,R) temp) --------
    dt_all = _softplus(dt_raw + dtb_ref[...])                              # (R, 4)
    dtA    = dt_all * A_ref[...]                                           # (R, 4)
    cum = dtA
    shift = 1
    while shift < seq_len:                                                 # ceil(log2(L)) steps
        part = pltpu.roll(cum, shift=shift, axis=0)
        cum = cum + jnp.where(pos >= shift, part, 0.0)                     # segmented at seq starts
        shift *= 2
    cum_t = cum.T                                                          # (NHEADS, R) tiny transpose

    # per-head dt-scaled x (f32; cast to bf16 per tile)
    xdt_heads = [x_all[:, h * HEAD_DIM:(h + 1) * HEAD_DIM] * dt_all[:, h:h + 1]
                 for h in range(NHEADS)]

    # ---------------- per-sequence (L x L) SSD tiles: no cross-sequence work ----------------
    ri = lax.broadcasted_iota(jnp.int32, (seq_len, seq_len), 0)
    ci = lax.broadcasted_iota(jnp.int32, (seq_len, seq_len), 1)
    causal = ci <= ri                                                      # (L, L)
    nt = (((1,), (1,)), ((), ()))                                          # contract last dims (C @ B^T)

    y_rows = []
    for q in range(spb):
        r0 = q * seq_len
        y_cols = []
        for g in range(N_GROUPS):
            Bq = B_all[r0:r0 + seq_len, g * D_STATE:(g + 1) * D_STATE].astype(bf16)
            Cq = C_all[r0:r0 + seq_len, g * D_STATE:(g + 1) * D_STATE].astype(bf16)
            CB = lax.dot_general(Cq, Bq, nt, preferred_element_type=f32)   # (L, L), recomputed per group
            for hl in range(HPG):
                h = g * HPG + hl
                # numerically-stable masked-difference decay: exp(cum_t - cum_s), clamped <= 0
                ld  = jnp.minimum(cum[r0:r0 + seq_len, h:h + 1]
                                  - cum_t[h:h + 1, r0:r0 + seq_len], 0.0)  # (L, L)
                dec = jnp.exp(ld.astype(exp_dtype)).astype(f32)            # bf16 EUP on v6e/v7x
                M   = jnp.where(causal, CB * dec, 0.0).astype(bf16)        # mask after exp
                xdt = xdt_heads[h][r0:r0 + seq_len, :].astype(bf16)        # (L, HEAD_DIM)
                y_cols.append(jnp.dot(M, xdt, preferred_element_type=f32))
        y_rows.append(jnp.concatenate(y_cols, axis=1))                     # (L, D_INNER)
    y = jnp.concatenate(y_rows, axis=0)                                    # (R, D_INNER)
    y = y + x_all * d_ref[...]                                             # D skip (f32, packed)

    # ---------------- gate with silu(z), grouped RMS norm (all in registers) ----------------
    y = y * _silu(z)
    groups = []
    for g in range(N_GROUPS):
        seg = y[:, g * GROUP_SZ:(g + 1) * GROUP_SZ]
        var = jnp.mean(seg * seg, axis=-1, keepdims=True)
        groups.append(seg * lax.rsqrt(var + RMS_EPS))
    yn = jnp.concatenate(groups, axis=-1) * norm_w_ref[...]

    # ---------------- out_proj (bf16 operands, f32 accum) + lane-dense packed store ----------------
    outp = jnp.dot(yn.astype(bf16), w_out_ref[...], preferred_element_type=f32)   # (R, 32)
    q_rows = R // PACK
    packed = jnp.concatenate(
        [outp[k * q_rows:(k + 1) * q_rows, :] for k in range(PACK)], axis=1)       # (R/4, 128)
    out_ref[...] = packed.astype(out_ref.dtype)


# --------------------------------------------------------------------------- #
#                                  Wrapper                                    #
# --------------------------------------------------------------------------- #
def _spb_ok(spb, batch, L):
    rows_blk = spb * L
    if rows_blk % PACK:
        return False
    if batch // spb == 1:                      # full-array block: always layout-legal
        return True
    return rows_blk % 8 == 0 and (rows_blk // PACK) % 8 == 0


def _pick_seq_per_block(batch, L):
    target = max(1, min(batch, _MAX_SPB, _ROWS_TARGET // max(L, 1)))
    for want_even in (True, False):            # prefer an even grid (v7x dual TensorCore)
        for spb in range(target, 0, -1):
            if batch % spb:
                continue
            if want_even and (batch // spb) % 2:
                continue
            if _spb_ok(spb, batch, L):
                return spb
    return batch


@functools.partial(jax.jit, static_argnames=("seq_per_block",))
def mamba2_forward(hidden, params, seq_per_block=None):
    w_in, conv_w, conv_b, A, D, dt_bias, norm_w, w_out = params
    batch, L, _ = hidden.shape

    if L > CHUNK:
        raise ValueError(f"seq_len={L} > chunk_size={CHUNK}: single-chunk SSD only")
    if seq_per_block is None:
        seq_per_block = _pick_seq_per_block(batch, L)
    if batch % seq_per_block:
        raise ValueError("batch must be divisible by seq_per_block")
    if not _spb_ok(seq_per_block, batch, L):
        raise ValueError("seq_per_block incompatible with (8,128) / lane-packing constraints")

    num_blocks = batch // seq_per_block
    rows_blk   = seq_per_block * L
    rows_tot   = batch * L
    q_blk      = rows_blk // PACK

    # --- weight layouts: [xBC | z] bf16 main weight, f32 dt weight, bf16 out_proj ---
    w_in_main = jnp.concatenate(
        [w_in[:, D_INNER:D_INNER + CONV_DIM],                 # xBC -> 0:128
         w_in[:, :D_INNER]],                                  # z   -> 128:192
        axis=1).astype(jnp.bfloat16)
    w_in_dt  = w_in[:, D_INNER + CONV_DIM:].astype(jnp.float32)            # dt columns, f32 path
    w_out_bf = w_out.astype(jnp.bfloat16)
    d_vec    = jnp.repeat(D.reshape(NHEADS), HEAD_DIM).reshape(1, D_INNER).astype(jnp.float32)

    hidden_flat = hidden.reshape(rows_tot, D_MODEL)

    # bf16 decay exp only where the EUP supports it (v6e / v7x); f32 elsewhere (v5e and older)
    try:
        kind = jax.devices()[0].device_kind.lower()
    except Exception:
        kind = ""
    exp_dtype = jnp.bfloat16 if ("v6" in kind or "v7" in kind) else jnp.float32

    itemsize = hidden.dtype.itemsize
    flops = int(
        2 * rows_tot * D_MODEL * (W_MAIN_DIM + NHEADS)                      # in_proj
        + 2 * rows_tot * CONV_DIM * D_CONV                                  # depthwise conv
        + 2 * rows_tot * L * (N_GROUPS * D_STATE + D_INNER)                 # per-sequence SSD
        + 2 * rows_tot * D_INNER * D_MODEL                                  # out_proj
    )
    transcendentals = int(rows_tot * (CONV_DIM + D_INNER + 2 * NHEADS + N_GROUPS)
                          + rows_tot * L * NHEADS)
    bytes_accessed = int(
        2 * rows_tot * D_MODEL * itemsize
        + (w_in_main.size + w_out_bf.size) * 2
        + (w_in_dt.size + conv_w.size + conv_b.size + A.size + dt_bias.size
           + norm_w.size + d_vec.size) * 4
    )
    cost = pl.CostEstimate(flops=flops, transcendentals=transcendentals,
                           bytes_accessed=bytes_accessed)

    grid_spec = pltpu.PrefetchScalarGridSpec(
        num_scalar_prefetch=0,
        grid=(num_blocks,),
        in_specs=[
            pl.BlockSpec((rows_blk, D_MODEL), lambda b: (b, 0)),            # hidden rows (f32)
            pl.BlockSpec((D_MODEL, W_MAIN_DIM), lambda b: (0, 0)),          # in_proj [xBC|z] (bf16)
            pl.BlockSpec((D_MODEL, NHEADS), lambda b: (0, 0)),              # in_proj dt cols (f32)
            pl.BlockSpec((D_CONV, CONV_DIM), lambda b: (0, 0)),             # conv weight (taps, channels)
            pl.BlockSpec((1, CONV_DIM), lambda b: (0, 0)),                  # conv bias
            pl.BlockSpec((1, NHEADS), lambda b: (0, 0)),                    # A
            pl.BlockSpec((1, NHEADS), lambda b: (0, 0)),                    # dt_bias
            pl.BlockSpec((1, D_INNER), lambda b: (0, 0)),                   # RMSNormGroup weight
            pl.BlockSpec((1, D_INNER), lambda b: (0, 0)),                   # D expanded per channel
            pl.BlockSpec((D_INNER, D_MODEL), lambda b: (0, 0)),             # out_proj weight (bf16)
        ],
        out_specs=pl.BlockSpec((q_blk, PACK * D_MODEL), lambda b: (b, 0)),  # lane-dense packed slab
    )

    kernel = functools.partial(mamba2_kernel, seq_len=L, exp_dtype=exp_dtype)
    out_packed = pl.pallas_call(
        kernel,
        out_shape=jax.ShapeDtypeStruct((rows_tot // PACK, PACK * D_MODEL), hidden.dtype),
        grid_spec=grid_spec,
        compiler_params=pltpu.CompilerParams(dimension_semantics=("parallel",)),
        cost_estimate=cost,
    )(hidden_flat, w_in_main, w_in_dt, conv_w, conv_b, A, dt_bias, norm_w, d_vec, w_out_bf)

    # un-permute the lane-dense slab: packed row i, lane-block k  <-  block-local row k*q_blk + i
    out = out_packed.reshape(num_blocks, q_blk, PACK, D_MODEL)
    out = out.transpose(0, 2, 1, 3).reshape(batch, L, D_MODEL)
    return out


# --------------------------------------------------------------------------- #
#                 Deterministic parameter init + pure-JAX reference           #
# --------------------------------------------------------------------------- #
def make_params(key):
    ks = jax.random.split(key, 8)
    w_in    = jax.random.normal(ks[0], (D_MODEL, D_IN_PROJ), jnp.float32) * 0.05
    conv_w  = jax.random.normal(ks[1], (D_CONV, CONV_DIM), jnp.float32) * 0.3
    conv_b  = jax.random.normal(ks[2], (1, CONV_DIM), jnp.float32) * 0.1
    A       = -(jax.random.uniform(ks[3], (1, NHEADS), jnp.float32) + 0.5)
    D       = jax.random.normal(ks[4], (1, NHEADS), jnp.float32) * 0.5
    dt_bias = jax.random.normal(ks[5], (1, NHEADS), jnp.float32) * 0.5
    norm_w  = 1.0 + 0.1 * jax.random.normal(ks[6], (1, D_INNER), jnp.float32)
    w_out   = jax.random.normal(ks[7], (D_INNER, D_MODEL), jnp.float32) * 0.05
    return (w_in, conv_w, conv_b, A, D, dt_bias, norm_w, w_out)


def mamba2_reference(hidden, params):
    """Sequential-recurrence reference (independent formulation of the scan)."""
    w_in, conv_w, conv_b, A, D, dt_bias, norm_w, w_out = params

    def one(h):
        L = h.shape[0]
        zxbcdt = jnp.dot(h, w_in, precision=lax.Precision.HIGHEST)
        z      = zxbcdt[:, :D_INNER]
        xBC    = zxbcdt[:, D_INNER:D_INNER + CONV_DIM]
        dt_raw = zxbcdt[:, D_INNER + CONV_DIM:]

        xp = jnp.concatenate(
            [jnp.zeros((D_CONV - 1, CONV_DIM), jnp.float32), xBC], axis=0)
        conv = jnp.zeros((L, CONV_DIM), jnp.float32) + conv_b
        for k in range(D_CONV):
            conv = conv + xp[k:k + L, :] * conv_w[k][None, :]
        conv = _silu(conv)

        x_all = conv[:, :D_INNER].reshape(L, NHEADS, HEAD_DIM)
        B_all = conv[:, D_INNER:D_INNER + N_GROUPS * D_STATE].reshape(L, N_GROUPS, D_STATE)
        C_all = conv[:, D_INNER + N_GROUPS * D_STATE:].reshape(L, N_GROUPS, D_STATE)

        dt = _softplus(dt_raw + dt_bias)                 # (L, NHEADS)
        dA = jnp.exp(dt * A)                             # (L, NHEADS)

        state = jnp.zeros((NHEADS, HEAD_DIM, D_STATE), jnp.float32)
        ys = []
        for t in range(L):
            Bt = jnp.repeat(B_all[t], HPG, axis=0)       # (NHEADS, D_STATE)
            Ct = jnp.repeat(C_all[t], HPG, axis=0)
            state = (state * dA[t][:, None, None]
                     + dt[t][:, None, None] * x_all[t][:, :, None] * Bt[:, None, :])
            yt = (jnp.einsum('hds,hs->hd', state, Ct, precision=lax.Precision.HIGHEST)
                  + D[0][:, None] * x_all[t])
            ys.append(yt.reshape(D_INNER))
        y = jnp.stack(ys, axis=0)                        # (L, D_INNER)

        y = y * _silu(z)
        yv = y.reshape(L, N_GROUPS, GROUP_SZ)
        var = jnp.mean(yv * yv, axis=-1, keepdims=True)
        yn = (yv * lax.rsqrt(var + RMS_EPS)).reshape(L, D_INNER) * norm_w[0]
        return jnp.dot(yn, w_out, precision=lax.Precision.HIGHEST)

    return jax.vmap(one)(hidden)


# --------------------------------------------------------------------------- #
if __name__ == "__main__":
    batch, seq = 8, 8                                    # seq <= chunk_size
    key = jax.random.PRNGKey(0)
    pkey, hkey = jax.random.split(key)
    params = make_params(pkey)
    hidden = jax.random.normal(hkey, (batch, seq, D_MODEL), jnp.float32)

    # 4 sequences per grid step -> 2 grid steps of 32 rows (even grid, exercises multi-block)
    out = mamba2_forward(hidden, params, seq_per_block=4)
    out = jax.block_until_ready(out)

    ref = mamba2_reference(hidden, params)
    max_err = float(jnp.max(jnp.abs(out - ref)))
    assert out.shape == (batch, seq, D_MODEL)
    # matmul operands (and the decay exp on v6e/v7x) are bf16 with f32 accumulation,
    # while the reference runs f32 HIGHEST -> use a correspondingly looser bound.
    assert max_err < 5e-2, f"max abs error too large: {max_err}"
    print("KERNEL_OK")
</pallas_src>

<mosaic_0001>
module attributes {stable_mosaic.version = 11 : i64} {
  func.func @mamba2_kernel(%arg0: i32, %arg1: memref<32x32xf32, #tpu.memory_space<vmem>>, %arg2: memref<32x192xbf16, #tpu.memory_space<vmem>>, %arg3: memref<32x4xf32, #tpu.memory_space<vmem>>, %arg4: memref<4x128xf32, #tpu.memory_space<vmem>>, %arg5: memref<1x128xf32, #tpu.memory_space<vmem>>, %arg6: memref<1x4xf32, #tpu.memory_space<vmem>>, %arg7: memref<1x4xf32, #tpu.memory_space<vmem>>, %arg8: memref<1x64xf32, #tpu.memory_space<vmem>>, %arg9: memref<1x64xf32, #tpu.memory_space<vmem>>, %arg10: memref<64x32xbf16, #tpu.memory_space<vmem>>, %arg11: memref<8x128xf32, #tpu.memory_space<vmem>>) attributes {dimension_semantics = [#tpu.dimension_semantics<parallel>], iteration_bounds = array<i64: 2>, scalar_prefetch = 0 : i64, scratch_operands = 0 : i64, tpu.core_type = #tpu.core_type<tc>, window_params = [{transform_indices = @transform_0, window_bounds = array<i64: 32, 32>}, {pipeline_mode = #tpu.pipeline_mode<synchronous>, transform_indices = @transform_1, window_bounds = array<i64: 32, 192>}, {pipeline_mode = #tpu.pipeline_mode<synchronous>, transform_indices = @transform_2, window_bounds = array<i64: 32, 4>}, {pipeline_mode = #tpu.pipeline_mode<synchronous>, transform_indices = @transform_3, window_bounds = array<i64: 4, 128>}, {pipeline_mode = #tpu.pipeline_mode<synchronous>, transform_indices = @transform_4, window_bounds = array<i64: 1, 128>}, {pipeline_mode = #tpu.pipeline_mode<synchronous>, transform_indices = @transform_5, window_bounds = array<i64: 1, 4>}, {pipeline_mode = #tpu.pipeline_mode<synchronous>, transform_indices = @transform_6, window_bounds = array<i64: 1, 4>}, {pipeline_mode = #tpu.pipeline_mode<synchronous>, transform_indices = @transform_7, window_bounds = array<i64: 1, 64>}, {pipeline_mode = #tpu.pipeline_mode<synchronous>, transform_indices = @transform_8, window_bounds = array<i64: 1, 64>}, {pipeline_mode = #tpu.pipeline_mode<synchronous>, transform_indices = @transform_9, window_bounds = array<i64: 64, 32>}, {transform_indices = @transform_10, window_bounds = array<i64: 8, 128>}]} {
    %c0 = arith.constant 0 : index
    %c0_0 = arith.constant 0 : index
    %0 = vector.load %arg1[%c0, %c0_0] : memref<32x32xf32, #tpu.memory_space<vmem>>, vector<32x32xf32>
    %1 = arith.truncf %0 : vector<32x32xf32> to vector<32x32xbf16>
    %c0_1 = arith.constant 0 : index
    %c0_2 = arith.constant 0 : index
    %2 = vector.load %arg2[%c0_1, %c0_2] : memref<32x192xbf16, #tpu.memory_space<vmem>>, vector<32x192xbf16>
    %cst = arith.constant dense<0.000000e+00> : vector<32x192xf32>
    %3 = tpu.matmul %1, %2, %cst {dimension_numbers = #tpu.dot_dimension_numbers<[1], [0], [0], [1], [0, 0, 1, 1], [], []>} : vector<32x32xbf16>, vector<32x192xbf16>, vector<32x192xf32> -> vector<32x192xf32>
    %4 = vector.extract_strided_slice %3 {offsets = [0, 0], sizes = [32, 128], strides = [1, 1]} : vector<32x192xf32> to vector<32x128xf32>
    %5 = vector.extract_strided_slice %3 {offsets = [0, 128], sizes = [32, 64], strides = [1, 1]} : vector<32x192xf32> to vector<32x64xf32>
    %c0_3 = arith.constant 0 : index
    %c0_4 = arith.constant 0 : index
    %6 = vector.load %arg3[%c0_3, %c0_4] : memref<32x4xf32, #tpu.memory_space<vmem>>, vector<32x4xf32>
    %cst_5 = arith.constant dense<0.000000e+00> : vector<32x4xf32>
    %7 = tpu.matmul %0, %6, %cst_5 {dimension_numbers = #tpu.dot_dimension_numbers<[1], [0], [0], [1], [0, 0, 1, 1], [], []>} : vector<32x32xf32>, vector<32x4xf32>, vector<32x4xf32> -> vector<32x4xf32>
    %8 = tpu.iota {dimensions = array<i32: 0>} : vector<32x1xi32>
    %c8_i32 = arith.constant 8 : i32
    %c0_i32 = arith.constant 0 : i32
    %9 = arith.cmpi eq, %c8_i32, %c0_i32 : i32
    %c1_i32 = arith.constant 1 : i32
    %10 = arith.select %9, %c1_i32, %c8_i32 : i32
    %11 = vector.broadcast %10 : i32 to vector<32x1xi32>
    %12 = arith.remsi %8, %11 : vector<32x1xi32>
    %c0_i32_6 = arith.constant 0 : i32
    %13 = vector.broadcast %c0_i32_6 : i32 to vector<32x1xi32>
    %14 = arith.cmpi ne, %12, %13 : vector<32x1xi32>
    %c0_i32_7 = arith.constant 0 : i32
    %15 = vector.broadcast %c0_i32_7 : i32 to vector<32x1xi32>
    %16 = arith.cmpi slt, %12, %15 : vector<32x1xi32>
    %c0_i32_8 = arith.constant 0 : i32
    %17 = arith.cmpi slt, %10, %c0_i32_8 : i32
    %18 = vector.broadcast %17 : i1 to vector<32x1xi1>
    %19 = vector.broadcast %18 : vector<32x1xi1> to vector<32x1xi1>
    %20 = arith.xori %16, %19 : vector<32x1xi1>
    %21 = arith.andi %20, %14 : vector<32x1xi1>
    %22 = vector.broadcast %10 : i32 to vector<32x1xi32>
    %23 = arith.addi %12, %22 : vector<32x1xi32>
    %24 = arith.select %21, %23, %12 : vector<32x1xi1>, vector<32x1xi32>
    %c0_9 = arith.constant 0 : index
    %c0_10 = arith.constant 0 : index
    %25 = vector.load %arg5[%c0_9, %c0_10] : memref<1x128xf32, #tpu.memory_space<vmem>>, vector<1x128xf32>
    %c3 = arith.constant 3 : index
    %c0_11 = arith.constant 0 : index
    %26 = vector.load %arg4[%c3, %c0_11] : memref<4x128xf32, #tpu.memory_space<vmem>>, vector<1x128xf32>
    %27 = vector.broadcast %26 : vector<1x128xf32> to vector<32x128xf32>
    %28 = arith.mulf %4, %27 : vector<32x128xf32>
    %29 = vector.broadcast %25 : vector<1x128xf32> to vector<32x128xf32>
    %30 = arith.addf %29, %28 : vector<32x128xf32>
    %c1_i32_12 = arith.constant 1 : i32
    %31 = tpu.dynamic_rotate %4 by %c1_i32_12 dim 0 : vector<32x128xf32>, i32 -> vector<32x128xf32>
    %c1_i32_13 = arith.constant 1 : i32
    %32 = vector.broadcast %c1_i32_13 : i32 to vector<32x1xi32>
    %33 = arith.cmpi sge, %24, %32 : vector<32x1xi32>
    %cst_14 = arith.constant 0.000000e+00 : f32
    %34 = vector.shape_cast %33 : vector<32x1xi1> to vector<32x1xi1>
    %35 = vector.broadcast %34 : vector<32x1xi1> to vector<32x128xi1>
    %36 = vector.broadcast %cst_14 : f32 to vector<32x128xf32>
    %37 = arith.select %35, %31, %36 : vector<32x128xi1>, vector<32x128xf32>
    %c2 = arith.constant 2 : index
    %c0_15 = arith.constant 0 : index
    %38 = vector.load %arg4[%c2, %c0_15] : memref<4x128xf32, #tpu.memory_space<vmem>>, vector<1x128xf32>
    %39 = vector.broadcast %38 : vector<1x128xf32> to vector<32x128xf32>
    %40 = arith.mulf %37, %39 : vector<32x128xf32>
    %41 = arith.addf %30, %40 : vector<32x128xf32>
    %c2_i32 = arith.constant 2 : i32
    %42 = tpu.dynamic_rotate %4 by %c2_i32 dim 0 : vector<32x128xf32>, i32 -> vector<32x128xf32>
    %c2_i32_16 = arith.constant 2 : i32
    %43 = vector.broadcast %c2_i32_16 : i32 to vector<32x1xi32>
    %44 = arith.cmpi sge, %24, %43 : vector<32x1xi32>
    %cst_17 = arith.constant 0.000000e+00 : f32
    %45 = vector.shape_cast %44 : vector<32x1xi1> to vector<32x1xi1>
    %46 = vector.broadcast %45 : vector<32x1xi1> to vector<32x128xi1>
    %47 = vector.broadcast %cst_17 : f32 to vector<32x128xf32>
    %48 = arith.select %46, %42, %47 : vector<32x128xi1>, vector<32x128xf32>
    %c1 = arith.constant 1 : index
    %c0_18 = arith.constant 0 : index
    %49 = vector.load %arg4[%c1, %c0_18] : memref<4x128xf32, #tpu.memory_space<vmem>>, vector<1x128xf32>
    %50 = vector.broadcast %49 : vector<1x128xf32> to vector<32x128xf32>
    %51 = arith.mulf %48, %50 : vector<32x128xf32>
    %52 = arith.addf %41, %51 : vector<32x128xf32>
    %c3_i32 = arith.constant 3 : i32
    %53 = tpu.dynamic_rotate %4 by %c3_i32 dim 0 : vector<32x128xf32>, i32 -> vector<32x128xf32>
    %c3_i32_19 = arith.constant 3 : i32
    %54 = vector.broadcast %c3_i32_19 : i32 to vector<32x1xi32>
    %55 = arith.cmpi sge, %24, %54 : vector<32x1xi32>
    %cst_20 = arith.constant 0.000000e+00 : f32
    %56 = vector.shape_cast %55 : vector<32x1xi1> to vector<32x1xi1>
    %57 = vector.broadcast %56 : vector<32x1xi1> to vector<32x128xi1>
    %58 = vector.broadcast %cst_20 : f32 to vector<32x128xf32>
    %59 = arith.select %57, %53, %58 : vector<32x128xi1>, vector<32x128xf32>
    %c0_21 = arith.constant 0 : index
    %c0_22 = arith.constant 0 : index
    %60 = vector.load %arg4[%c0_21, %c0_22] : memref<4x128xf32, #tpu.memory_space<vmem>>, vector<1x128xf32>
    %61 = vector.broadcast %60 : vector<1x128xf32> to vector<32x128xf32>
    %62 = arith.mulf %59, %61 : vector<32x128xf32>
    %63 = arith.addf %52, %62 : vector<32x128xf32>
    %cst_23 = arith.constant 0.000000e+00 : f32
    %64 = vector.broadcast %cst_23 : f32 to vector<32x128xf32>
    %65 = arith.subf %64, %63 : vector<32x128xf32>
    %66 = math.exp %65 : vector<32x128xf32>
    %cst_24 = arith.constant 1.000000e+00 : f32
    %67 = vector.broadcast %cst_24 : f32 to vector<32x128xf32>
    %68 = arith.addf %67, %66 : vector<32x128xf32>
    %cst_25 = arith.constant 1.000000e+00 : f32
    %69 = vector.broadcast %cst_25 : f32 to vector<32x128xf32>
    %70 = arith.divf %69, %68 : vector<32x128xf32>
    %71 = arith.mulf %63, %70 : vector<32x128xf32>
    %72 = vector.extract_strided_slice %71 {offsets = [0, 0], sizes = [32, 64], strides = [1, 1]} : vector<32x128xf32> to vector<32x64xf32>
    %73 = vector.extract_strided_slice %71 {offsets = [0, 64], sizes = [32, 32], strides = [1, 1]} : vector<32x128xf32> to vector<32x32xf32>
    %74 = vector.extract_strided_slice %71 {offsets = [0, 96], sizes = [32, 32], strides = [1, 1]} : vector<32x128xf32> to vector<32x32xf32>
    %c0_26 = arith.constant 0 : index
    %c0_27 = arith.constant 0 : index
    %75 = vector.load %arg7[%c0_26, %c0_27] : memref<1x4xf32, #tpu.memory_space<vmem>>, vector<1x4xf32>
    %76 = vector.broadcast %75 : vector<1x4xf32> to vector<32x4xf32>
    %77 = arith.addf %7, %76 : vector<32x4xf32>
    %cst_28 = arith.constant 2.000000e+01 : f32
    %78 = vector.broadcast %cst_28 : f32 to vector<32x4xf32>
    %79 = arith.cmpf ogt, %77, %78 : vector<32x4xf32>
    %cst_29 = arith.constant 2.000000e+01 : f32
    %80 = vector.broadcast %cst_29 : f32 to vector<32x4xf32>
    %81 = arith.minimumf %77, %80 : vector<32x4xf32>
    %82 = math.exp %81 : vector<32x4xf32>
    %83 = math.log1p %82 : vector<32x4xf32>
    %84 = arith.select %79, %77, %83 : vector<32x4xi1>, vector<32x4xf32>
    %c0_30 = arith.constant 0 : index
    %c0_31 = arith.constant 0 : index
    %85 = vector.load %arg6[%c0_30, %c0_31] : memref<1x4xf32, #tpu.memory_space<vmem>>, vector<1x4xf32>
    %86 = vector.broadcast %85 : vector<1x4xf32> to vector<32x4xf32>
    %87 = arith.mulf %84, %86 : vector<32x4xf32>
    %c1_i32_32 = arith.constant 1 : i32
    %88 = tpu.dynamic_rotate %87 by %c1_i32_32 dim 0 : vector<32x4xf32>, i32 -> vector<32x4xf32>
    %c1_i32_33 = arith.constant 1 : i32
    %89 = vector.broadcast %c1_i32_33 : i32 to vector<32x1xi32>
    %90 = arith.cmpi sge, %24, %89 : vector<32x1xi32>
    %cst_34 = arith.constant 0.000000e+00 : f32
    %91 = vector.shape_cast %90 : vector<32x1xi1> to vector<32x1xi1>
    %92 = vector.broadcast %91 : vector<32x1xi1> to vector<32x4xi1>
    %93 = vector.broadcast %cst_34 : f32 to vector<32x4xf32>
    %94 = arith.select %92, %88, %93 : vector<32x4xi1>, vector<32x4xf32>
    %95 = arith.addf %87, %94 : vector<32x4xf32>
    %c2_i32_35 = arith.constant 2 : i32
    %96 = tpu.dynamic_rotate %95 by %c2_i32_35 dim 0 : vector<32x4xf32>, i32 -> vector<32x4xf32>
    %c2_i32_36 = arith.constant 2 : i32
    %97 = vector.broadcast %c2_i32_36 : i32 to vector<32x1xi32>
    %98 = arith.cmpi sge, %24, %97 : vector<32x1xi32>
    %cst_37 = arith.constant 0.000000e+00 : f32
    %99 = vector.shape_cast %98 : vector<32x1xi1> to vector<32x1xi1>
    %100 = vector.broadcast %99 : vector<32x1xi1> to vector<32x4xi1>
    %101 = vector.broadcast %cst_37 : f32 to vector<32x4xf32>
    %102 = arith.select %100, %96, %101 : vector<32x4xi1>, vector<32x4xf32>
    %103 = arith.addf %95, %102 : vector<32x4xf32>
    %c4_i32 = arith.constant 4 : i32
    %104 = tpu.dynamic_rotate %103 by %c4_i32 dim 0 : vector<32x4xf32>, i32 -> vector<32x4xf32>
    %c4_i32_38 = arith.constant 4 : i32
    %105 = vector.broadcast %c4_i32_38 : i32 to vector<32x1xi32>
    %106 = arith.cmpi sge, %24, %105 : vector<32x1xi32>
    %cst_39 = arith.constant 0.000000e+00 : f32
    %107 = vector.shape_cast %106 : vector<32x1xi1> to vector<32x1xi1>
    %108 = vector.broadcast %107 : vector<32x1xi1> to vector<32x4xi1>
    %109 = vector.broadcast %cst_39 : f32 to vector<32x4xf32>
    %110 = arith.select %108, %104, %109 : vector<32x4xi1>, vector<32x4xf32>
    %111 = arith.addf %103, %110 : vector<32x4xf32>
    %112 = tpu.transpose %111, [1, 0] : vector<32x4xf32> -> vector<4x32xf32>
    %113 = vector.extract_strided_slice %72 {offsets = [0, 0], sizes = [32, 16], strides = [1, 1]} : vector<32x64xf32> to vector<32x16xf32>
    %114 = vector.extract_strided_slice %84 {offsets = [0, 0], sizes = [32, 1], strides = [1, 1]} : vector<32x4xf32> to vector<32x1xf32>
    %115 = vector.broadcast %114 : vector<32x1xf32> to vector<32x16xf32>
    %116 = arith.mulf %113, %115 : vector<32x16xf32>
    %117 = vector.extract_strided_slice %72 {offsets = [0, 16], sizes = [32, 16], strides = [1, 1]} : vector<32x64xf32> to vector<32x16xf32>
    %118 = vector.extract_strided_slice %84 {offsets = [0, 1], sizes = [32, 1], strides = [1, 1]} : vector<32x4xf32> to vector<32x1xf32>
    %119 = vector.broadcast %118 : vector<32x1xf32> to vector<32x16xf32>
    %120 = arith.mulf %117, %119 : vector<32x16xf32>
    %121 = vector.extract_strided_slice %72 {offsets = [0, 32], sizes = [32, 16], strides = [1, 1]} : vector<32x64xf32> to vector<32x16xf32>
    %122 = vector.extract_strided_slice %84 {offsets = [0, 2], sizes = [32, 1], strides = [1, 1]} : vector<32x4xf32> to vector<32x1xf32>
    %123 = vector.broadcast %122 : vector<32x1xf32> to vector<32x16xf32>
    %124 = arith.mulf %121, %123 : vector<32x16xf32>
    %125 = vector.extract_strided_slice %72 {offsets = [0, 48], sizes = [32, 16], strides = [1, 1]} : vector<32x64xf32> to vector<32x16xf32>
    %126 = vector.extract_strided_slice %84 {offsets = [0, 3], sizes = [32, 1], strides = [1, 1]} : vector<32x4xf32> to vector<32x1xf32>
    %127 = vector.broadcast %126 : vector<32x1xf32> to vector<32x16xf32>
    %128 = arith.mulf %125, %127 : vector<32x16xf32>
    %129 = tpu.iota {dimensions = array<i32: 0>} : vector<8x8xi32>
    %130 = tpu.iota {dimensions = array<i32: 1>} : vector<8x8xi32>
    %131 = arith.cmpi sle, %130, %129 : vector<8x8xi32>
    %132 = vector.extract_strided_slice %73 {offsets = [0, 0], sizes = [8, 16], strides = [1, 1]} : vector<32x32xf32> to vector<8x16xf32>
    %133 = arith.truncf %132 : vector<8x16xf32> to vector<8x16xbf16>
    %134 = vector.extract_strided_slice %74 {offsets = [0, 0], sizes = [8, 16], strides = [1, 1]} : vector<32x32xf32> to vector<8x16xf32>
    %135 = arith.truncf %134 : vector<8x16xf32> to vector<8x16xbf16>
    %cst_40 = arith.constant dense<0.000000e+00> : vector<8x8xf32>
    %136 = tpu.matmul %135, %133, %cst_40 {dimension_numbers = #tpu.dot_dimension_numbers<[1], [1], [0], [0], [0, 0, 1, 0], [], []>} : vector<8x16xbf16>, vector<8x16xbf16>, vector<8x8xf32> -> vector<8x8xf32>
    %137 = vector.extract_strided_slice %111 {offsets = [0, 0], sizes = [8, 1], strides = [1, 1]} : vector<32x4xf32> to vector<8x1xf32>
    %138 = vector.extract_strided_slice %112 {offsets = [0, 0], sizes = [1, 8], strides = [1, 1]} : vector<4x32xf32> to vector<1x8xf32>
    %139 = vector.broadcast %137 : vector<8x1xf32> to vector<8x8xf32>
    %140 = vector.broadcast %138 : vector<1x8xf32> to vector<8x8xf32>
    %141 = arith.subf %139, %140 : vector<8x8xf32>
    %cst_41 = arith.constant 0.000000e+00 : f32
    %142 = vector.broadcast %cst_41 : f32 to vector<8x8xf32>
    %143 = arith.minimumf %141, %142 : vector<8x8xf32>
    %144 = math.exp %143 : vector<8x8xf32>
    %145 = arith.mulf %136, %144 : vector<8x8xf32>
    %cst_42 = arith.constant 0.000000e+00 : f32
    %146 = vector.broadcast %cst_42 : f32 to vector<8x8xf32>
    %147 = arith.select %131, %145, %146 : vector<8x8xi1>, vector<8x8xf32>
    %148 = arith.truncf %147 : vector<8x8xf32> to vector<8x8xbf16>
    %149 = vector.extract_strided_slice %116 {offsets = [0, 0], sizes = [8, 16], strides = [1, 1]} : vector<32x16xf32> to vector<8x16xf32>
    %150 = arith.truncf %149 : vector<8x16xf32> to vector<8x16xbf16>
    %cst_43 = arith.constant dense<0.000000e+00> : vector<8x16xf32>
    %151 = tpu.matmul %148, %150, %cst_43 {dimension_numbers = #tpu.dot_dimension_numbers<[1], [0], [0], [1], [0, 0, 1, 1], [], []>} : vector<8x8xbf16>, vector<8x16xbf16>, vector<8x16xf32> -> vector<8x16xf32>
    %152 = vector.extract_strided_slice %111 {offsets = [0, 1], sizes = [8, 1], strides = [1, 1]} : vector<32x4xf32> to vector<8x1xf32>
    %153 = vector.extract_strided_slice %112 {offsets = [1, 0], sizes = [1, 8], strides = [1, 1]} : vector<4x32xf32> to vector<1x8xf32>
    %154 = vector.broadcast %152 : vector<8x1xf32> to vector<8x8xf32>
    %155 = vector.broadcast %153 : vector<1x8xf32> to vector<8x8xf32>
    %156 = arith.subf %154, %155 : vector<8x8xf32>
    %cst_44 = arith.constant 0.000000e+00 : f32
    %157 = vector.broadcast %cst_44 : f32 to vector<8x8xf32>
    %158 = arith.minimumf %156, %157 : vector<8x8xf32>
    %159 = math.exp %158 : vector<8x8xf32>
    %160 = arith.mulf %136, %159 : vector<8x8xf32>
    %cst_45 = arith.constant 0.000000e+00 : f32
    %161 = vector.broadcast %cst_45 : f32 to vector<8x8xf32>
    %162 = arith.select %131, %160, %161 : vector<8x8xi1>, vector<8x8xf32>
    %163 = arith.truncf %162 : vector<8x8xf32> to vector<8x8xbf16>
    %164 = vector.extract_strided_slice %120 {offsets = [0, 0], sizes = [8, 16], strides = [1, 1]} : vector<32x16xf32> to vector<8x16xf32>
    %165 = arith.truncf %164 : vector<8x16xf32> to vector<8x16xbf16>
    %cst_46 = arith.constant dense<0.000000e+00> : vector<8x16xf32>
    %166 = tpu.matmul %163, %165, %cst_46 {dimension_numbers = #tpu.dot_dimension_numbers<[1], [0], [0], [1], [0, 0, 1, 1], [], []>} : vector<8x8xbf16>, vector<8x16xbf16>, vector<8x16xf32> -> vector<8x16xf32>
    %167 = vector.extract_strided_slice %73 {offsets = [0, 16], sizes = [8, 16], strides = [1, 1]} : vector<32x32xf32> to vector<8x16xf32>
    %168 = arith.truncf %167 : vector<8x16xf32> to vector<8x16xbf16>
    %169 = vector.extract_strided_slice %74 {offsets = [0, 16], sizes = [8, 16], strides = [1, 1]} : vector<32x32xf32> to vector<8x16xf32>
    %170 = arith.truncf %169 : vector<8x16xf32> to vector<8x16xbf16>
    %cst_47 = arith.constant dense<0.000000e+00> : vector<8x8xf32>
    %171 = tpu.matmul %170, %168, %cst_47 {dimension_numbers = #tpu.dot_dimension_numbers<[1], [1], [0], [0], [0, 0, 1, 0], [], []>} : vector<8x16xbf16>, vector<8x16xbf16>, vector<8x8xf32> -> vector<8x8xf32>
    %172 = vector.extract_strided_slice %111 {offsets = [0, 2], sizes = [8, 1], strides = [1, 1]} : vector<32x4xf32> to vector<8x1xf32>
    %173 = vector.extract_strided_slice %112 {offsets = [2, 0], sizes = [1, 8], strides = [1, 1]} : vector<4x32xf32> to vector<1x8xf32>
    %174 = vector.broadcast %172 : vector<8x1xf32> to vector<8x8xf32>
    %175 = vector.broadcast %173 : vector<1x8xf32> to vector<8x8xf32>
    %176 = arith.subf %174, %175 : vector<8x8xf32>
    %cst_48 = arith.constant 0.000000e+00 : f32
    %177 = vector.broadcast %cst_48 : f32 to vector<8x8xf32>
    %178 = arith.minimumf %176, %177 : vector<8x8xf32>
    %179 = math.exp %178 : vector<8x8xf32>
    %180 = arith.mulf %171, %179 : vector<8x8xf32>
    %cst_49 = arith.constant 0.000000e+00 : f32
    %181 = vector.broadcast %cst_49 : f32 to vector<8x8xf32>
    %182 = arith.select %131, %180, %181 : vector<8x8xi1>, vector<8x8xf32>
    %183 = arith.truncf %182 : vector<8x8xf32> to vector<8x8xbf16>
    %184 = vector.extract_strided_slice %124 {offsets = [0, 0], sizes = [8, 16], strides = [1, 1]} : vector<32x16xf32> to vector<8x16xf32>
    %185 = arith.truncf %184 : vector<8x16xf32> to vector<8x16xbf16>
    %cst_50 = arith.constant dense<0.000000e+00> : vector<8x16xf32>
    %186 = tpu.matmul %183, %185, %cst_50 {dimension_numbers = #tpu.dot_dimension_numbers<[1], [0], [0], [1], [0, 0, 1, 1], [], []>} : vector<8x8xbf16>, vector<8x16xbf16>, vector<8x16xf32> -> vector<8x16xf32>
    %187 = vector.extract_strided_slice %111 {offsets = [0, 3], sizes = [8, 1], strides = [1, 1]} : vector<32x4xf32> to vector<8x1xf32>
    %188 = vector.extract_strided_slice %112 {offsets = [3, 0], sizes = [1, 8], strides = [1, 1]} : vector<4x32xf32> to vector<1x8xf32>
    %189 = vector.broadcast %187 : vector<8x1xf32> to vector<8x8xf32>
    %190 = vector.broadcast %188 : vector<1x8xf32> to vector<8x8xf32>
    %191 = arith.subf %189, %190 : vector<8x8xf32>
    %cst_51 = arith.constant 0.000000e+00 : f32
    %192 = vector.broadcast %cst_51 : f32 to vector<8x8xf32>
    %193 = arith.minimumf %191, %192 : vector<8x8xf32>
    %194 = math.exp %193 : vector<8x8xf32>
    %195 = arith.mulf %171, %194 : vector<8x8xf32>
    %cst_52 = arith.constant 0.000000e+00 : f32
    %196 = vector.broadcast %cst_52 : f32 to vector<8x8xf32>
    %197 = arith.select %131, %195, %196 : vector<8x8xi1>, vector<8x8xf32>
    %198 = arith.truncf %197 : vector<8x8xf32> to vector<8x8xbf16>
    %199 = vector.extract_strided_slice %128 {offsets = [0, 0], sizes = [8, 16], strides = [1, 1]} : vector<32x16xf32> to vector<8x16xf32>
    %200 = arith.truncf %199 : vector<8x16xf32> to vector<8x16xbf16>
    %cst_53 = arith.constant dense<0.000000e+00> : vector<8x16xf32>
    %201 = tpu.matmul %198, %200, %cst_53 {dimension_numbers = #tpu.dot_dimension_numbers<[1], [0], [0], [1], [0, 0, 1, 1], [], []>} : vector<8x8xbf16>, vector<8x16xbf16>, vector<8x16xf32> -> vector<8x16xf32>
    %202 = tpu.concatenate %151, %166, %186, %201 in 1 : vector<8x16xf32>, vector<8x16xf32>, vector<8x16xf32>, vector<8x16xf32> -> vector<8x64xf32>
    %203 = vector.extract_strided_slice %73 {offsets = [8, 0], sizes = [8, 16], strides = [1, 1]} : vector<32x32xf32> to vector<8x16xf32>
    %204 = arith.truncf %203 : vector<8x16xf32> to vector<8x16xbf16>
    %205 = vector.extract_strided_slice %74 {offsets = [8, 0], sizes = [8, 16], strides = [1, 1]} : vector<32x32xf32> to vector<8x16xf32>
    %206 = arith.truncf %205 : vector<8x16xf32> to vector<8x16xbf16>
    %cst_54 = arith.constant dense<0.000000e+00> : vector<8x8xf32>
    %207 = tpu.matmul %206, %204, %cst_54 {dimension_numbers = #tpu.dot_dimension_numbers<[1], [1], [0], [0], [0, 0, 1, 0], [], []>} : vector<8x16xbf16>, vector<8x16xbf16>, vector<8x8xf32> -> vector<8x8xf32>
    %208 = vector.extract_strided_slice %111 {offsets = [8, 0], sizes = [8, 1], strides = [1, 1]} : vector<32x4xf32> to vector<8x1xf32>
    %209 = vector.extract_strided_slice %112 {offsets = [0, 8], sizes = [1, 8], strides = [1, 1]} : vector<4x32xf32> to vector<1x8xf32>
    %210 = vector.broadcast %208 : vector<8x1xf32> to vector<8x8xf32>
    %211 = vector.broadcast %209 : vector<1x8xf32> to vector<8x8xf32>
    %212 = arith.subf %210, %211 : vector<8x8xf32>
    %cst_55 = arith.constant 0.000000e+00 : f32
    %213 = vector.broadcast %cst_55 : f32 to vector<8x8xf32>
    %214 = arith.minimumf %212, %213 : vector<8x8xf32>
    %215 = math.exp %214 : vector<8x8xf32>
    %216 = arith.mulf %207, %215 : vector<8x8xf32>
    %cst_56 = arith.constant 0.000000e+00 : f32
    %217 = vector.broadcast %cst_56 : f32 to vector<8x8xf32>
    %218 = arith.select %131, %216, %217 : vector<8x8xi1>, vector<8x8xf32>
    %219 = arith.truncf %218 : vector<8x8xf32> to vector<8x8xbf16>
    %220 = vector.extract_strided_slice %116 {offsets = [8, 0], sizes = [8, 16], strides = [1, 1]} : vector<32x16xf32> to vector<8x16xf32>
    %221 = arith.truncf %220 : vector<8x16xf32> to vector<8x16xbf16>
    %cst_57 = arith.constant dense<0.000000e+00> : vector<8x16xf32>
    %222 = tpu.matmul %219, %221, %cst_57 {dimension_numbers = #tpu.dot_dimension_numbers<[1], [0], [0], [1], [0, 0, 1, 1], [], []>} : vector<8x8xbf16>, vector<8x16xbf16>, vector<8x16xf32> -> vector<8x16xf32>
    %223 = vector.extract_strided_slice %111 {offsets = [8, 1], sizes = [8, 1], strides = [1, 1]} : vector<32x4xf32> to vector<8x1xf32>
    %224 = vector.extract_strided_slice %112 {offsets = [1, 8], sizes = [1, 8], strides = [1, 1]} : vector<4x32xf32> to vector<1x8xf32>
    %225 = vector.broadcast %223 : vector<8x1xf32> to vector<8x8xf32>
    %226 = vector.broadcast %224 : vector<1x8xf32> to vector<8x8xf32>
    %227 = arith.subf %225, %226 : vector<8x8xf32>
    %cst_58 = arith.constant 0.000000e+00 : f32
    %228 = vector.broadcast %cst_58 : f32 to vector<8x8xf32>
    %229 = arith.minimumf %227, %228 : vector<8x8xf32>
    %230 = math.exp %229 : vector<8x8xf32>
    %231 = arith.mulf %207, %230 : vector<8x8xf32>
    %cst_59 = arith.constant 0.000000e+00 : f32
    %232 = vector.broadcast %cst_59 : f32 to vector<8x8xf32>
    %233 = arith.select %131, %231, %232 : vector<8x8xi1>, vector<8x8xf32>
    %234 = arith.truncf %233 : vector<8x8xf32> to vector<8x8xbf16>
    %235 = vector.extract_strided_slice %120 {offsets = [8, 0], sizes = [8, 16], strides = [1, 1]} : vector<32x16xf32> to vector<8x16xf32>
    %236 = arith.truncf %235 : vector<8x16xf32> to vector<8x16xbf16>
    %cst_60 = arith.constant dense<0.000000e+00> : vector<8x16xf32>
    %237 = tpu.matmul %234, %236, %cst_60 {dimension_numbers = #tpu.dot_dimension_numbers<[1], [0], [0], [1], [0, 0, 1, 1], [], []>} : vector<8x8xbf16>, vector<8x16xbf16>, vector<8x16xf32> -> vector<8x16xf32>
    %238 = vector.extract_strided_slice %73 {offsets = [8, 16], sizes = [8, 16], strides = [1, 1]} : vector<32x32xf32> to vector<8x16xf32>
    %239 = arith.truncf %238 : vector<8x16xf32> to vector<8x16xbf16>
    %240 = vector.extract_strided_slice %74 {offsets = [8, 16], sizes = [8, 16], strides = [1, 1]} : vector<32x32xf32> to vector<8x16xf32>
    %241 = arith.truncf %240 : vector<8x16xf32> to vector<8x16xbf16>
    %cst_61 = arith.constant dense<0.000000e+00> : vector<8x8xf32>
    %242 = tpu.matmul %241, %239, %cst_61 {dimension_numbers = #tpu.dot_dimension_numbers<[1], [1], [0], [0], [0, 0, 1, 0], [], []>} : vector<8x16xbf16>, vector<8x16xbf16>, vector<8x8xf32> -> vector<8x8xf32>
    %243 = vector.extract_strided_slice %111 {offsets = [8, 2], sizes = [8, 1], strides = [1, 1]} : vector<32x4xf32> to vector<8x1xf32>
    %244 = vector.extract_strided_slice %112 {offsets = [2, 8], sizes = [1, 8], strides = [1, 1]} : vector<4x32xf32> to vector<1x8xf32>
    %245 = vector.broadcast %243 : vector<8x1xf32> to vector<8x8xf32>
    %246 = vector.broadcast %244 : vector<1x8xf32> to vector<8x8xf32>
    %247 = arith.subf %245, %246 : vector<8x8xf32>
    %cst_62 = arith.constant 0.000000e+00 : f32
    %248 = vector.broadcast %cst_62 : f32 to vector<8x8xf32>
    %249 = arith.minimumf %247, %248 : vector<8x8xf32>
    %250 = math.exp %249 : vector<8x8xf32>
    %251 = arith.mulf %242, %250 : vector<8x8xf32>
    %cst_63 = arith.constant 0.000000e+00 : f32
    %252 = vector.broadcast %cst_63 : f32 to vector<8x8xf32>
    %253 = arith.select %131, %251, %252 : vector<8x8xi1>, vector<8x8xf32>
    %254 = arith.truncf %253 : vector<8x8xf32> to vector<8x8xbf16>
    %255 = vector.extract_strided_slice %124 {offsets = [8, 0], sizes = [8, 16], strides = [1, 1]} : vector<32x16xf32> to vector<8x16xf32>
    %256 = arith.truncf %255 : vector<8x16xf32> to vector<8x16xbf16>
    %cst_64 = arith.constant dense<0.000000e+00> : vector<8x16xf32>
    %257 = tpu.matmul %254, %256, %cst_64 {dimension_numbers = #tpu.dot_dimension_numbers<[1], [0], [0], [1], [0, 0, 1, 1], [], []>} : vector<8x8xbf16>, vector<8x16xbf16>, vector<8x16xf32> -> vector<8x16xf32>
    %258 = vector.extract_strided_slice %111 {offsets = [8, 3], sizes = [8, 1], strides = [1, 1]} : vector<32x4xf32> to vector<8x1xf32>
    %259 = vector.extract_strided_slice %112 {offsets = [3, 8], sizes = [1, 8], strides = [1, 1]} : vector<4x32xf32> to vector<1x8xf32>
    %260 = vector.broadcast %258 : vector<8x1xf32> to vector<8x8xf32>
    %261 = vector.broadcast %259 : vector<1x8xf32> to vector<8x8xf32>
    %262 = arith.subf %260, %261 : vector<8x8xf32>
    %cst_65 = arith.constant 0.000000e+00 : f32
    %263 = vector.broadcast %cst_65 : f32 to vector<8x8xf32>
    %264 = arith.minimumf %262, %263 : vector<8x8xf32>
    %265 = math.exp %264 : vector<8x8xf32>
    %266 = arith.mulf %242, %265 : vector<8x8xf32>
    %cst_66 = arith.constant 0.000000e+00 : f32
    %267 = vector.broadcast %cst_66 : f32 to vector<8x8xf32>
    %268 = arith.select %131, %266, %267 : vector<8x8xi1>, vector<8x8xf32>
    %269 = arith.truncf %268 : vector<8x8xf32> to vector<8x8xbf16>
    %270 = vector.extract_strided_slice %128 {offsets = [8, 0], sizes = [8, 16], strides = [1, 1]} : vector<32x16xf32> to vector<8x16xf32>
    %271 = arith.truncf %270 : vector<8x16xf32> to vector<8x16xbf16>
    %cst_67 = arith.constant dense<0.000000e+00> : vector<8x16xf32>
    %272 = tpu.matmul %269, %271, %cst_67 {dimension_numbers = #tpu.dot_dimension_numbers<[1], [0], [0], [1], [0, 0, 1, 1], [], []>} : vector<8x8xbf16>, vector<8x16xbf16>, vector<8x16xf32> -> vector<8x16xf32>
    %273 = tpu.concatenate %222, %237, %257, %272 in 1 : vector<8x16xf32>, vector<8x16xf32>, vector<8x16xf32>, vector<8x16xf32> -> vector<8x64xf32>
    %274 = vector.extract_strided_slice %73 {offsets = [16, 0], sizes = [8, 16], strides = [1, 1]} : vector<32x32xf32> to vector<8x16xf32>
    %275 = arith.truncf %274 : vector<8x16xf32> to vector<8x16xbf16>
    %276 = vector.extract_strided_slice %74 {offsets = [16, 0], sizes = [8, 16], strides = [1, 1]} : vector<32x32xf32> to vector<8x16xf32>
    %277 = arith.truncf %276 : vector<8x16xf32> to vector<8x16xbf16>
    %cst_68 = arith.constant dense<0.000000e+00> : vector<8x8xf32>
    %278 = tpu.matmul %277, %275, %cst_68 {dimension_numbers = #tpu.dot_dimension_numbers<[1], [1], [0], [0], [0, 0, 1, 0], [], []>} : vector<8x16xbf16>, vector<8x16xbf16>, vector<8x8xf32> -> vector<8x8xf32>
    %279 = vector.extract_strided_slice %111 {offsets = [16, 0], sizes = [8, 1], strides = [1, 1]} : vector<32x4xf32> to vector<8x1xf32>
    %280 = vector.extract_strided_slice %112 {offsets = [0, 16], sizes = [1, 8], strides = [1, 1]} : vector<4x32xf32> to vector<1x8xf32>
    %281 = vector.broadcast %279 : vector<8x1xf32> to vector<8x8xf32>
    %282 = vector.broadcast %280 : vector<1x8xf32> to vector<8x8xf32>
    %283 = arith.subf %281, %282 : vector<8x8xf32>
    %cst_69 = arith.constant 0.000000e+00 : f32
    %284 = vector.broadcast %cst_69 : f32 to vector<8x8xf32>
    %285 = arith.minimumf %283, %284 : vector<8x8xf32>
    %286 = math.exp %285 : vector<8x8xf32>
    %287 = arith.mulf %278, %286 : vector<8x8xf32>
    %cst_70 = arith.constant 0.000000e+00 : f32
    %288 = vector.broadcast %cst_70 : f32 to vector<8x8xf32>
    %289 = arith.select %131, %287, %288 : vector<8x8xi1>, vector<8x8xf32>
    %290 = arith.truncf %289 : vector<8x8xf32> to vector<8x8xbf16>
    %291 = vector.extract_strided_slice %116 {offsets = [16, 0], sizes = [8, 16], strides = [1, 1]} : vector<32x16xf32> to vector<8x16xf32>
    %292 = arith.truncf %291 : vector<8x16xf32> to vector<8x16xbf16>
    %cst_71 = arith.constant dense<0.000000e+00> : vector<8x16xf32>
    %293 = tpu.matmul %290, %292, %cst_71 {dimension_numbers = #tpu.dot_dimension_numbers<[1], [0], [0], [1], [0, 0, 1, 1], [], []>} : vector<8x8xbf16>, vector<8x16xbf16>, vector<8x16xf32> -> vector<8x16xf32>
    %294 = vector.extract_strided_slice %111 {offsets = [16, 1], sizes = [8, 1], strides = [1, 1]} : vector<32x4xf32> to vector<8x1xf32>
    %295 = vector.extract_strided_slice %112 {offsets = [1, 16], sizes = [1, 8], strides = [1, 1]} : vector<4x32xf32> to vector<1x8xf32>
    %296 = vector.broadcast %294 : vector<8x1xf32> to vector<8x8xf32>
    %297 = vector.broadcast %295 : vector<1x8xf32> to vector<8x8xf32>
    %298 = arith.subf %296, %297 : vector<8x8xf32>
    %cst_72 = arith.constant 0.000000e+00 : f32
    %299 = vector.broadcast %cst_72 : f32 to vector<8x8xf32>
    %300 = arith.minimumf %298, %299 : vector<8x8xf32>
    %301 = math.exp %300 : vector<8x8xf32>
    %302 = arith.mulf %278, %301 : vector<8x8xf32>
    %cst_73 = arith.constant 0.000000e+00 : f32
    %303 = vector.broadcast %cst_73 : f32 to vector<8x8xf32>
    %304 = arith.select %131, %302, %303 : vector<8x8xi1>, vector<8x8xf32>
    %305 = arith.truncf %304 : vector<8x8xf32> to vector<8x8xbf16>
    %306 = vector.extract_strided_slice %120 {offsets = [16, 0], sizes = [8, 16], strides = [1, 1]} : vector<32x16xf32> to vector<8x16xf32>
    %307 = arith.truncf %306 : vector<8x16xf32> to vector<8x16xbf16>
    %cst_74 = arith.constant dense<0.000000e+00> : vector<8x16xf32>
    %308 = tpu.matmul %305, %307, %cst_74 {dimension_numbers = #tpu.dot_dimension_numbers<[1], [0], [0], [1], [0, 0, 1, 1], [], []>} : vector<8x8xbf16>, vector<8x16xbf16>, vector<8x16xf32> -> vector<8x16xf32>
    %309 = vector.extract_strided_slice %73 {offsets = [16, 16], sizes = [8, 16], strides = [1, 1]} : vector<32x32xf32> to vector<8x16xf32>
    %310 = arith.truncf %309 : vector<8x16xf32> to vector<8x16xbf16>
    %311 = vector.extract_strided_slice %74 {offsets = [16, 16], sizes = [8, 16], strides = [1, 1]} : vector<32x32xf32> to vector<8x16xf32>
    %312 = arith.truncf %311 : vector<8x16xf32> to vector<8x16xbf16>
    %cst_75 = arith.constant dense<0.000000e+00> : vector<8x8xf32>
    %313 = tpu.matmul %312, %310, %cst_75 {dimension_numbers = #tpu.dot_dimension_numbers<[1], [1], [0], [0], [0, 0, 1, 0], [], []>} : vector<8x16xbf16>, vector<8x16xbf16>, vector<8x8xf32> -> vector<8x8xf32>
    %314 = vector.extract_strided_slice %111 {offsets = [16, 2], sizes = [8, 1], strides = [1, 1]} : vector<32x4xf32> to vector<8x1xf32>
    %315 = vector.extract_strided_slice %112 {offsets = [2, 16], sizes = [1, 8], strides = [1, 1]} : vector<4x32xf32> to vector<1x8xf32>
    %316 = vector.broadcast %314 : vector<8x1xf32> to vector<8x8xf32>
    %317 = vector.broadcast %315 : vector<1x8xf32> to vector<8x8xf32>
    %318 = arith.subf %316, %317 : vector<8x8xf32>
    %cst_76 = arith.constant 0.000000e+00 : f32
    %319 = vector.broadcast %cst_76 : f32 to vector<8x8xf32>
    %320 = arith.minimumf %318, %319 : vector<8x8xf32>
    %321 = math.exp %320 : vector<8x8xf32>
    %322 = arith.mulf %313, %321 : vector<8x8xf32>
    %cst_77 = arith.constant 0.000000e+00 : f32
    %323 = vector.broadcast %cst_77 : f32 to vector<8x8xf32>
    %324 = arith.select %131, %322, %323 : vector<8x8xi1>, vector<8x8xf32>
    %325 = arith.truncf %324 : vector<8x8xf32> to vector<8x8xbf16>
    %326 = vector.extract_strided_slice %124 {offsets = [16, 0], sizes = [8, 16], strides = [1, 1]} : vector<32x16xf32> to vector<8x16xf32>
    %327 = arith.truncf %326 : vector<8x16xf32> to vector<8x16xbf16>
    %cst_78 = arith.constant dense<0.000000e+00> : vector<8x16xf32>
    %328 = tpu.matmul %325, %327, %cst_78 {dimension_numbers = #tpu.dot_dimension_numbers<[1], [0], [0], [1], [0, 0, 1, 1], [], []>} : vector<8x8xbf16>, vector<8x16xbf16>, vector<8x16xf32> -> vector<8x16xf32>
    %329 = vector.extract_strided_slice %111 {offsets = [16, 3], sizes = [8, 1], strides = [1, 1]} : vector<32x4xf32> to vector<8x1xf32>
    %330 = vector.extract_strided_slice %112 {offsets = [3, 16], sizes = [1, 8], strides = [1, 1]} : vector<4x32xf32> to vector<1x8xf32>
    %331 = vector.broadcast %329 : vector<8x1xf32> to vector<8x8xf32>
    %332 = vector.broadcast %330 : vector<1x8xf32> to vector<8x8xf32>
    %333 = arith.subf %331, %332 : vector<8x8xf32>
    %cst_79 = arith.constant 0.000000e+00 : f32
    %334 = vector.broadcast %cst_79 : f32 to vector<8x8xf32>
    %335 = arith.minimumf %333, %334 : vector<8x8xf32>
    %336 = math.exp %335 : vector<8x8xf32>
    %337 = arith.mulf %313, %336 : vector<8x8xf32>
    %cst_80 = arith.constant 0.000000e+00 : f32
    %338 = vector.broadcast %cst_80 : f32 to vector<8x8xf32>
    %339 = arith.select %131, %337, %338 : vector<8x8xi1>, vector<8x8xf32>
    %340 = arith.truncf %339 : vector<8x8xf32> to vector<8x8xbf16>
    %341 = vector.extract_strided_slice %128 {offsets = [16, 0], sizes = [8, 16], strides = [1, 1]} : vector<32x16xf32> to vector<8x16xf32>
    %342 = arith.truncf %341 : vector<8x16xf32> to vector<8x16xbf16>
    %cst_81 = arith.constant dense<0.000000e+00> : vector<8x16xf32>
    %343 = tpu.matmul %340, %342, %cst_81 {dimension_numbers = #tpu.dot_dimension_numbers<[1], [0], [0], [1], [0, 0, 1, 1], [], []>} : vector<8x8xbf16>, vector<8x16xbf16>, vector<8x16xf32> -> vector<8x16xf32>
    %344 = tpu.concatenate %293, %308, %328, %343 in 1 : vector<8x16xf32>, vector<8x16xf32>, vector<8x16xf32>, vector<8x16xf32> -> vector<8x64xf32>
    %345 = vector.extract_strided_slice %73 {offsets = [24, 0], sizes = [8, 16], strides = [1, 1]} : vector<32x32xf32> to vector<8x16xf32>
    %346 = arith.truncf %345 : vector<8x16xf32> to vector<8x16xbf16>
    %347 = vector.extract_strided_slice %74 {offsets = [24, 0], sizes = [8, 16], strides = [1, 1]} : vector<32x32xf32> to vector<8x16xf32>
    %348 = arith.truncf %347 : vector<8x16xf32> to vector<8x16xbf16>
    %cst_82 = arith.constant dense<0.000000e+00> : vector<8x8xf32>
    %349 = tpu.matmul %348, %346, %cst_82 {dimension_numbers = #tpu.dot_dimension_numbers<[1], [1], [0], [0], [0, 0, 1, 0], [], []>} : vector<8x16xbf16>, vector<8x16xbf16>, vector<8x8xf32> -> vector<8x8xf32>
    %350 = vector.extract_strided_slice %111 {offsets = [24, 0], sizes = [8, 1], strides = [1, 1]} : vector<32x4xf32> to vector<8x1xf32>
    %351 = vector.extract_strided_slice %112 {offsets = [0, 24], sizes = [1, 8], strides = [1, 1]} : vector<4x32xf32> to vector<1x8xf32>
    %352 = vector.broadcast %350 : vector<8x1xf32> to vector<8x8xf32>
    %353 = vector.broadcast %351 : vector<1x8xf32> to vector<8x8xf32>
    %354 = arith.subf %352, %353 : vector<8x8xf32>
    %cst_83 = arith.constant 0.000000e+00 : f32
    %355 = vector.broadcast %cst_83 : f32 to vector<8x8xf32>
    %356 = arith.minimumf %354, %355 : vector<8x8xf32>
    %357 = math.exp %356 : vector<8x8xf32>
    %358 = arith.mulf %349, %357 : vector<8x8xf32>
    %cst_84 = arith.constant 0.000000e+00 : f32
    %359 = vector.broadcast %cst_84 : f32 to vector<8x8xf32>
    %360 = arith.select %131, %358, %359 : vector<8x8xi1>, vector<8x8xf32>
    %361 = arith.truncf %360 : vector<8x8xf32> to vector<8x8xbf16>
    %362 = vector.extract_strided_slice %116 {offsets = [24, 0], sizes = [8, 16], strides = [1, 1]} : vector<32x16xf32> to vector<8x16xf32>
    %363 = arith.truncf %362 : vector<8x16xf32> to vector<8x16xbf16>
    %cst_85 = arith.constant dense<0.000000e+00> : vector<8x16xf32>
    %364 = tpu.matmul %361, %363, %cst_85 {dimension_numbers = #tpu.dot_dimension_numbers<[1], [0], [0], [1], [0, 0, 1, 1], [], []>} : vector<8x8xbf16>, vector<8x16xbf16>, vector<8x16xf32> -> vector<8x16xf32>
    %365 = vector.extract_strided_slice %111 {offsets = [24, 1], sizes = [8, 1], strides = [1, 1]} : vector<32x4xf32> to vector<8x1xf32>
    %366 = vector.extract_strided_slice %112 {offsets = [1, 24], sizes = [1, 8], strides = [1, 1]} : vector<4x32xf32> to vector<1x8xf32>
    %367 = vector.broadcast %365 : vector<8x1xf32> to vector<8x8xf32>
    %368 = vector.broadcast %366 : vector<1x8xf32> to vector<8x8xf32>
    %369 = arith.subf %367, %368 : vector<8x8xf32>
    %cst_86 = arith.constant 0.000000e+00 : f32
    %370 = vector.broadcast %cst_86 : f32 to vector<8x8xf32>
    %371 = arith.minimumf %369, %370 : vector<8x8xf32>
    %372 = math.exp %371 : vector<8x8xf32>
    %373 = arith.mulf %349, %372 : vector<8x8xf32>
    %cst_87 = arith.constant 0.000000e+00 : f32
    %374 = vector.broadcast %cst_87 : f32 to vector<8x8xf32>
    %375 = arith.select %131, %373, %374 : vector<8x8xi1>, vector<8x8xf32>
    %376 = arith.truncf %375 : vector<8x8xf32> to vector<8x8xbf16>
    %377 = vector.extract_strided_slice %120 {offsets = [24, 0], sizes = [8, 16], strides = [1, 1]} : vector<32x16xf32> to vector<8x16xf32>
    %378 = arith.truncf %377 : vector<8x16xf32> to vector<8x16xbf16>
    %cst_88 = arith.constant dense<0.000000e+00> : vector<8x16xf32>
    %379 = tpu.matmul %376, %378, %cst_88 {dimension_numbers = #tpu.dot_dimension_numbers<[1], [0], [0], [1], [0, 0, 1, 1], [], []>} : vector<8x8xbf16>, vector<8x16xbf16>, vector<8x16xf32> -> vector<8x16xf32>
    %380 = vector.extract_strided_slice %73 {offsets = [24, 16], sizes = [8, 16], strides = [1, 1]} : vector<32x32xf32> to vector<8x16xf32>
    %381 = arith.truncf %380 : vector<8x16xf32> to vector<8x16xbf16>
    %382 = vector.extract_strided_slice %74 {offsets = [24, 16], sizes = [8, 16], strides = [1, 1]} : vector<32x32xf32> to vector<8x16xf32>
    %383 = arith.truncf %382 : vector<8x16xf32> to vector<8x16xbf16>
    %cst_89 = arith.constant dense<0.000000e+00> : vector<8x8xf32>
    %384 = tpu.matmul %383, %381, %cst_89 {dimension_numbers = #tpu.dot_dimension_numbers<[1], [1], [0], [0], [0, 0, 1, 0], [], []>} : vector<8x16xbf16>, vector<8x16xbf16>, vector<8x8xf32> -> vector<8x8xf32>
    %385 = vector.extract_strided_slice %111 {offsets = [24, 2], sizes = [8, 1], strides = [1, 1]} : vector<32x4xf32> to vector<8x1xf32>
    %386 = vector.extract_strided_slice %112 {offsets = [2, 24], sizes = [1, 8], strides = [1, 1]} : vector<4x32xf32> to vector<1x8xf32>
    %387 = vector.broadcast %385 : vector<8x1xf32> to vector<8x8xf32>
    %388 = vector.broadcast %386 : vector<1x8xf32> to vector<8x8xf32>
    %389 = arith.subf %387, %388 : vector<8x8xf32>
    %cst_90 = arith.constant 0.000000e+00 : f32
    %390 = vector.broadcast %cst_90 : f32 to vector<8x8xf32>
    %391 = arith.minimumf %389, %390 : vector<8x8xf32>
    %392 = math.exp %391 : vector<8x8xf32>
    %393 = arith.mulf %384, %392 : vector<8x8xf32>
    %cst_91 = arith.constant 0.000000e+00 : f32
    %394 = vector.broadcast %cst_91 : f32 to vector<8x8xf32>
    %395 = arith.select %131, %393, %394 : vector<8x8xi1>, vector<8x8xf32>
    %396 = arith.truncf %395 : vector<8x8xf32> to vector<8x8xbf16>
    %397 = vector.extract_strided_slice %124 {offsets = [24, 0], sizes = [8, 16], strides = [1, 1]} : vector<32x16xf32> to vector<8x16xf32>
    %398 = arith.truncf %397 : vector<8x16xf32> to vector<8x16xbf16>
    %cst_92 = arith.constant dense<0.000000e+00> : vector<8x16xf32>
    %399 = tpu.matmul %396, %398, %cst_92 {dimension_numbers = #tpu.dot_dimension_numbers<[1], [0], [0], [1], [0, 0, 1, 1], [], []>} : vector<8x8xbf16>, vector<8x16xbf16>, vector<8x16xf32> -> vector<8x16xf32>
    %400 = vector.extract_strided_slice %111 {offsets = [24, 3], sizes = [8, 1], strides = [1, 1]} : vector<32x4xf32> to vector<8x1xf32>
    %401 = vector.extract_strided_slice %112 {offsets = [3, 24], sizes = [1, 8], strides = [1, 1]} : vector<4x32xf32> to vector<1x8xf32>
    %402 = vector.broadcast %400 : vector<8x1xf32> to vector<8x8xf32>
    %403 = vector.broadcast %401 : vector<1x8xf32> to vector<8x8xf32>
    %404 = arith.subf %402, %403 : vector<8x8xf32>
    %cst_93 = arith.constant 0.000000e+00 : f32
    %405 = vector.broadcast %cst_93 : f32 to vector<8x8xf32>
    %406 = arith.minimumf %404, %405 : vector<8x8xf32>
    %407 = math.exp %406 : vector<8x8xf32>
    %408 = arith.mulf %384, %407 : vector<8x8xf32>
    %cst_94 = arith.constant 0.000000e+00 : f32
    %409 = vector.broadcast %cst_94 : f32 to vector<8x8xf32>
    %410 = arith.select %131, %408, %409 : vector<8x8xi1>, vector<8x8xf32>
    %411 = arith.truncf %410 : vector<8x8xf32> to vector<8x8xbf16>
    %412 = vector.extract_strided_slice %128 {offsets = [24, 0], sizes = [8, 16], strides = [1, 1]} : vector<32x16xf32> to vector<8x16xf32>
    %413 = arith.truncf %412 : vector<8x16xf32> to vector<8x16xbf16>
    %cst_95 = arith.constant dense<0.000000e+00> : vector<8x16xf32>
    %414 = tpu.matmul %411, %413, %cst_95 {dimension_numbers = #tpu.dot_dimension_numbers<[1], [0], [0], [1], [0, 0, 1, 1], [], []>} : vector<8x8xbf16>, vector<8x16xbf16>, vector<8x16xf32> -> vector<8x16xf32>
    %415 = tpu.concatenate %364, %379, %399, %414 in 1 : vector<8x16xf32>, vector<8x16xf32>, vector<8x16xf32>, vector<8x16xf32> -> vector<8x64xf32>
    %416 = tpu.concatenate %202, %273, %344, %415 in 0 : vector<8x64xf32>, vector<8x64xf32>, vector<8x64xf32>, vector<8x64xf32> -> vector<32x64xf32>
    %c0_96 = arith.constant 0 : index
    %c0_97 = arith.constant 0 : index
    %417 = vector.load %arg9[%c0_96, %c0_97] : memref<1x64xf32, #tpu.memory_space<vmem>>, vector<1x64xf32>
    %418 = vector.broadcast %417 : vector<1x64xf32> to vector<32x64xf32>
    %419 = arith.mulf %72, %418 : vector<32x64xf32>
    %420 = arith.addf %416, %419 : vector<32x64xf32>
    %cst_98 = arith.constant 0.000000e+00 : f32
    %421 = vector.broadcast %cst_98 : f32 to vector<32x64xf32>
    %422 = arith.subf %421, %5 : vector<32x64xf32>
    %423 = math.exp %422 : vector<32x64xf32>
    %cst_99 = arith.constant 1.000000e+00 : f32
    %424 = vector.broadcast %cst_99 : f32 to vector<32x64xf32>
    %425 = arith.addf %424, %423 : vector<32x64xf32>
    %cst_100 = arith.constant 1.000000e+00 : f32
    %426 = vector.broadcast %cst_100 : f32 to vector<32x64xf32>
    %427 = arith.divf %426, %425 : vector<32x64xf32>
    %428 = arith.mulf %5, %427 : vector<32x64xf32>
    %429 = arith.mulf %420, %428 : vector<32x64xf32>
    %430 = vector.extract_strided_slice %429 {offsets = [0, 0], sizes = [32, 32], strides = [1, 1]} : vector<32x64xf32> to vector<32x32xf32>
    %431 = arith.mulf %430, %430 : vector<32x32xf32>
    %cst_101 = arith.constant dense<0.000000e+00> : vector<32xf32>
    %432 = vector.multi_reduction <add>, %431, %cst_101 [1] : vector<32x32xf32> to vector<32xf32>
    %433 = vector.shape_cast %432 : vector<32xf32> to vector<32x1xf32>
    %cst_102 = arith.constant 3.200000e+01 : f32
    %434 = vector.broadcast %cst_102 : f32 to vector<32x1xf32>
    %435 = arith.divf %433, %434 : vector<32x1xf32>
    %cst_103 = arith.constant 9.99999974E-6 : f32
    %436 = vector.broadcast %cst_103 : f32 to vector<32x1xf32>
    %437 = arith.addf %435, %436 : vector<32x1xf32>
    %438 = math.rsqrt %437 : vector<32x1xf32>
    %439 = vector.broadcast %438 : vector<32x1xf32> to vector<32x32xf32>
    %440 = arith.mulf %430, %439 : vector<32x32xf32>
    %441 = vector.extract_strided_slice %429 {offsets = [0, 32], sizes = [32, 32], strides = [1, 1]} : vector<32x64xf32> to vector<32x32xf32>
    %442 = arith.mulf %441, %441 : vector<32x32xf32>
    %cst_104 = arith.constant dense<0.000000e+00> : vector<32xf32>
    %443 = vector.multi_reduction <add>, %442, %cst_104 [1] : vector<32x32xf32> to vector<32xf32>
    %444 = vector.shape_cast %443 : vector<32xf32> to vector<32x1xf32>
    %cst_105 = arith.constant 3.200000e+01 : f32
    %445 = vector.broadcast %cst_105 : f32 to vector<32x1xf32>
    %446 = arith.divf %444, %445 : vector<32x1xf32>
    %cst_106 = arith.constant 9.99999974E-6 : f32
    %447 = vector.broadcast %cst_106 : f32 to vector<32x1xf32>
    %448 = arith.addf %446, %447 : vector<32x1xf32>
    %449 = math.rsqrt %448 : vector<32x1xf32>
    %450 = vector.broadcast %449 : vector<32x1xf32> to vector<32x32xf32>
    %451 = arith.mulf %441, %450 : vector<32x32xf32>
    %452 = tpu.concatenate %440, %451 in 1 : vector<32x32xf32>, vector<32x32xf32> -> vector<32x64xf32>
    %c0_107 = arith.constant 0 : index
    %c0_108 = arith.constant 0 : index
    %453 = vector.load %arg8[%c0_107, %c0_108] : memref<1x64xf32, #tpu.memory_space<vmem>>, vector<1x64xf32>
    %454 = vector.broadcast %453 : vector<1x64xf32> to vector<32x64xf32>
    %455 = arith.mulf %452, %454 : vector<32x64xf32>
    %456 = arith.truncf %455 : vector<32x64xf32> to vector<32x64xbf16>
    %c0_109 = arith.constant 0 : index
    %c0_110 = arith.constant 0 : index
    %457 = vector.load %arg10[%c0_109, %c0_110] : memref<64x32xbf16, #tpu.memory_space<vmem>>, vector<64x32xbf16>
    %cst_111 = arith.constant dense<0.000000e+00> : vector<32x32xf32>
    %458 = tpu.matmul %456, %457, %cst_111 {dimension_numbers = #tpu.dot_dimension_numbers<[1], [0], [0], [1], [0, 0, 1, 1], [], []>} : vector<32x64xbf16>, vector<64x32xbf16>, vector<32x32xf32> -> vector<32x32xf32>
    %459 = vector.extract_strided_slice %458 {offsets = [0, 0], sizes = [8, 32], strides = [1, 1]} : vector<32x32xf32> to vector<8x32xf32>
    %460 = vector.extract_strided_slice %458 {offsets = [8, 0], sizes = [8, 32], strides = [1, 1]} : vector<32x32xf32> to vector<8x32xf32>
    %461 = vector.extract_strided_slice %458 {offsets = [16, 0], sizes = [8, 32], strides = [1, 1]} : vector<32x32xf32> to vector<8x32xf32>
    %462 = vector.extract_strided_slice %458 {offsets = [24, 0], sizes = [8, 32], strides = [1, 1]} : vector<32x32xf32> to vector<8x32xf32>
    %463 = tpu.concatenate %459, %460, %461, %462 in 1 : vector<8x32xf32>, vector<8x32xf32>, vector<8x32xf32>, vector<8x32xf32> -> vector<8x128xf32>
    %c0_112 = arith.constant 0 : index
    %c0_113 = arith.constant 0 : index
    %464 = vector.load %arg11[%c0_112, %c0_113] : memref<8x128xf32, #tpu.memory_space<vmem>>, vector<8x128xf32>
    tpu.vector_store %arg11[%c0_112, %c0_113], %463 {strides = array<i32>} : memref<8x128xf32, #tpu.memory_space<vmem>>, vector<8x128xf32>,
    return
  }
  func.func @transform_0(%arg0: i32) -> (i32, i32) {
    %c0_i32 = arith.constant 0 : i32
    %c0_i32_0 = arith.constant 0 : i32
    return %arg0, %c0_i32 : i32, i32
  }
  func.func @transform_1(%arg0: i32) -> (i32, i32) {
    %c0_i32 = arith.constant 0 : i32
    %c0_i32_0 = arith.constant 0 : i32
    %c0_i32_1 = arith.constant 0 : i32
    return %c0_i32, %c0_i32_0 : i32, i32
  }
  func.func @transform_2(%arg0: i32) -> (i32, i32) {
    %c0_i32 = arith.constant 0 : i32
    %c0_i32_0 = arith.constant 0 : i32
    %c0_i32_1 = arith.constant 0 : i32
    return %c0_i32, %c0_i32_0 : i32, i32
  }
  func.func @transform_3(%arg0: i32) -> (i32, i32) {
    %c0_i32 = arith.constant 0 : i32
    %c0_i32_0 = arith.constant 0 : i32
    %c0_i32_1 = arith.constant 0 : i32
    return %c0_i32, %c0_i32_0 : i32, i32
  }
  func.func @transform_4(%arg0: i32) -> (i32, i32) {
    %c0_i32 = arith.constant 0 : i32
    %c0_i32_0 = arith.constant 0 : i32
    %c0_i32_1 = arith.constant 0 : i32
    return %c0_i32, %c0_i32_0 : i32, i32
  }
  func.func @transform_5(%arg0: i32) -> (i32, i32) {
    %c0_i32 = arith.constant 0 : i32
    %c0_i32_0 = arith.constant 0 : i32
    %c0_i32_1 = arith.constant 0 : i32
    return %c0_i32, %c0_i32_0 : i32, i32
  }
  func.func @transform_6(%arg0: i32) -> (i32, i32) {
    %c0_i32 = arith.constant 0 : i32
    %c0_i32_0 = arith.constant 0 : i32
    %c0_i32_1 = arith.constant 0 : i32
    return %c0_i32, %c0_i32_0 : i32, i32
  }
  func.func @transform_7(%arg0: i32) -> (i32, i32) {
    %c0_i32 = arith.constant 0 : i32
    %c0_i32_0 = arith.constant 0 : i32
    %c0_i32_1 = arith.constant 0 : i32
    return %c0_i32, %c0_i32_0 : i32, i32
  }
  func.func @transform_8(%arg0: i32) -> (i32, i32) {
    %c0_i32 = arith.constant 0 : i32
    %c0_i32_0 = arith.constant 0 : i32
    %c0_i32_1 = arith.constant 0 : i32
    return %c0_i32, %c0_i32_0 : i32, i32
  }
  func.func @transform_9(%arg0: i32) -> (i32, i32) {
    %c0_i32 = arith.constant 0 : i32
    %c0_i32_0 = arith.constant 0 : i32
    %c0_i32_1 = arith.constant 0 : i32
    return %c0_i32, %c0_i32_0 : i32, i32
  }
  func.func @transform_10(%arg0: i32) -> (i32, i32) {
    %c0_i32 = arith.constant 0 : i32
    %c0_i32_0 = arith.constant 0 : i32
    return %arg0, %c0_i32 : i32, i32
  }
}

</mosaic_0001>

<bundles_post_ra>
// kernel: mamba2_forward.1
= control target key start
LH: loop header
LB: loop body
LE: loop exit
PB: predicated region body
PF: predicated region fallthrough
CT: control target
= control target key end

     0   :  { %s3357_s13 = smov 0   ;;  %s4307_s0 = inlined_call_operand.vmem [shape: f32[64,32], index: 0, kind: input, shape index: {}]   ;;  %s4308_s1 = inlined_call_operand.vmem [shape: bf16[32,192], index: 1, kind: input, shape index: {}]   ;;  %s4309_s2 = inlined_call_operand.vmem [shape: f32[32,4], index: 2, kind: input, shape index: {}]   ;;  %s4310_s3 = inlined_call_operand.vmem [shape: f32[4,128], index: 3, kind: input, shape index: {}]   ;;  %s4311_s4 = inlined_call_operand.vmem [shape: f32[1,128], index: 4, kind: input, shape index: {}]   ;;  %s4312_s5 = inlined_call_operand.vmem [shape: f32[1,4], index: 5, kind: input, shape index: {}]   ;;  %s4313_s6 = inlined_call_operand.vmem [shape: f32[1,4], index: 6, kind: input, shape index: {}]   ;;  %s4314_s7 = inlined_call_operand.vmem [shape: f32[1,64], index: 7, kind: input, shape index: {}]   ;;  %s4315_s8 = inlined_call_operand.vmem [shape: f32[1,64], index: 8, kind: input, shape index: {}]   ;;  %s4316_s9 = inlined_call_operand.vmem [shape: bf16[64,32], index: 9, kind: input, shape index: {}]   ;;  %s4317_s10 = inlined_call_operand.vmem [shape: f32[16,128], index: 10, kind: output, shape index: {}]  }
   0x1 LB: > { %s3363_s14 = sadd.s32 4294967295, %s3285_s13   ;;  %p2828_p0 = scmp.ge.s32.totalorder %s3285_s13, 1  ;;  %s3285_s13 = sphi %s3357_s13, %s20_s13  }
   0x2   : > { %p313_p1 = scmp.lt.s32.totalorder %s3285_s13, 3 }
   0x4   : > { %p314_p2 = pnand %p2828_p0, %p313_p1 }
   0x5   : > { %v3173_v0 = vld [vmem:[%s4308_s1 + $0x4] ss:$8 sps:$4 sm:$0xff] (!%p314_p2)   ;;  %s2829_s17 = sshll.u32 (!%p314_p2), %s3363_s14, 2  ;;  %v3175_v3 = vld [vmem:[%s4308_s1] ss:$8 sps:$4 sm:$0xff] (!%p314_p2)   ;;  %v3287_v4 = vmov (!%p314_p2), 0   ;;  %v455_v17 = vlaneseq (!%p314_p2) }
   0x6   : > { %317 = sbr.rel (%p314_p2) target bundleno = 3167 (0xc5f), region = 60  ;;  %v451_v1 = vld [vmem:[%s4309_s2] sm:$0xff] (!%p314_p2)  ;;  %v452_v2 = vld [vmem:[%s4309_s2 + $0x8] sm:$0xff] (!%p314_p2)  ;;  %430 = vmatprep.mubr.bf16.mxu0 (!%p314_p2), %v3287_v4  ;;  %p351_p3 = scmp.lt.s32.totalorder (!%p314_p2), %s2829_s17, 7  ;;  %3146 = vset.pattern.permute.xlu1 (!%p314_p2), %v3287_v4  ;;  %v3176_v6 = vld [vmem:[%s4308_s1 + $0x14] ss:$8 sps:$4 sm:$0xff] (!%p314_p2)  }
   0x7   : > { %398 = vmatprep.subr.bf16.mxu0 (!%p314_p2), %v3173_v0  ;;  %v3115_v5 = vpack.c.bf16 (!%p314_p2), %v452_v2, %v451_v1  ;;  %v453_v7 = vld [vmem:[%s4309_s2 + $0x10] sm:$0xff] (!%p314_p2)  ;;  %v454_v8 = vld [vmem:[%s4309_s2 + $0x18] sm:$0xff] (!%p314_p2)  ;;  %vm4318_vm0 = vcmask (!%p314_p2), 261120   ;;  %v3405_v18 = vshrl.u32 (!%p314_p2), %v455_v17, 7  ;;  %v3415_v22 = vld [vmem:[%s4310_s3 + $0x3] ss:$0 sm:$0xff] (!%p314_p2) }
   0x8   : > { %399 = vmatpush1.bf16.msra.mxu0 (!%p314_p2), %v3175_v3  ;;  %v3178_v9 = vld [vmem:[%s4308_s1 + $0x10] ss:$8 sps:$4 sm:$0xff] (!%p314_p2)   ;;  %v3119_v10 = vpack.c.bf16 (!%p314_p2), %v454_v8, %v453_v7  ;;  %v2843_v24 = vld [vmem:[%s4313_s6] ss:$0 sm:$0xff] (!%p314_p2)  ;;  %v3448_v37 = vld [vmem:[%s4310_s3 + $0x2] ss:$0 sm:$0xff] (!%p314_p2) }
   0x9   : > { %3116 = vmatprep.subr.bf16.mxu1 (!%p314_p2), %v3115_v5  ;;  %400 = vmatprep.subr.bf16.mxu0 (!%p314_p2), %v3176_v6  ;;  %v457_v19 = vadd.s32 (!%p314_p2), 8, %v3405_v18  ;;  %vm532_vm1 = vcmp.lt.s32.totalorder (!%p314_p2), %v3405_v18, 1  ;;  %vm4321_vm3 = vcmp.lt.s32.totalorder (!%p314_p2), %v3405_v18, 2  ;;  %vm608_vm4 = vcmp.lt.s32.totalorder (!%p314_p2), %v3405_v18, 3  ;;  %v3429_v25 = vld [vmem:[%s4311_s4] ss:$0 sm:$0xff] (!%p314_p2) }
   0xa   : > { %3118 = vmatpush3.bf16.msra.mxu1 (!%p314_p2), %v3115_v5  ;;  %v458_v29 = vadd.s32 (!%p314_p2), 16, %v3405_v18  ;;  %v3453_v38 = vld [vmem:[%s4310_s3 + $0x1] ss:$0 sm:$0xff] (!%p314_p2)  ;;  %v3470_v44 = vld [vmem:[%s4310_s3] ss:$0 sm:$0xff] (!%p314_p2)  ;;  %v459_v7 = vadd.s32 (!%p314_p2), 24, %v3405_v18 }
   0xb   : > { %3120 = vmatprep.subr.bf16.mxu1 (!%p314_p2), %v3119_v10  ;;  %v3408_v20 = vand.u32 (!%p314_p2), 7, %v457_v19  ;;  %s3292_s15 = smov (!%p314_p2), 48   ;;  %s3293_s16 = smov (!%p314_p2), 32  }
   0xc   : > { %401 = vmatpush1.bf16.msra.mxu0 (!%p314_p2), %v3178_v9  ;;  %v3482_v50 = vand.u32 (!%p314_p2), 7, %v458_v29  ;;  %s3298_s19 = smov (!%p314_p2), 96   ;;  %s3299_s20 = smov (!%p314_p2), 80  }
   0xd   : > { %s4356_s17 = smov (!%p351_p3, %s2829_s17), 7  ;;  %vm538_vm2 = vcmp.ge.s32.totalorder %v3408_v20, 1  ;;  %vm4320_vm5 = vcmp.ge.s32.totalorder %v3408_v20, 2  ;;  %vm614_vm6 = vcmp.ge.s32.totalorder %v3408_v20, 3  ;;  %s3300_s21 = smov 120  }
   0xe   : > { %s2830_s12 = sshll.u32 %s4356_s17, 3  ;;  %3122 = vmatpush3.bf16.msra.mxu1 %v3119_v10  ;;  %vm539_vm7 = vcmp.ge.s32.totalorder %v3482_v50, 1  ;;  %vm4319_vm8 = vcmp.ge.s32.totalorder %v3482_v50, 2  ;;  %vm615_vm9 = vcmp.ge.s32.totalorder %v3482_v50, 3  ;;  %s3297_s17 = smov 112  }
   0xf   : > { %s354_s18 = scalar_lea.vmem %s4307_s0, %s2830_s12  ;;  %s3291_s12 = smov 64  }
  0x10   : > { %v361_v11 = vld [vmem:[%s354_s18] sm:$0xff]  ;;  %v362_v12 = vld [vmem:[%s354_s18 + $0x8] sm:$0xff]  ;;  %v363_v14 = vld [vmem:[%s354_s18 + $0x10] sm:$0xff]  ;;  %s3301_s22 = smov 104   ;;  %p356_p4 = scmp.lt.s32.totalorder %s3363_s14, 1 }
  0x11   : > { %v365_v13 = vpack.c.bf16 %v362_v12, %v361_v11  ;;  %2953 = vmatprep.mubr.msk.f32.mxu1 %vm4318_vm0, %v361_v11  ;;  %v364_v15 = vld [vmem:[%s354_s18 + $0x18] sm:$0xff]  ;;  %s3294_s18 = smov 16  }
  0x12   : > { %2954 = vmatmul.mubr.msk.f32.vlgmr.msra.gmra.mrb[0].mxu1 %vm4318_vm0, %v362_v12  ;;  %v366_v16 = vpack.c.bf16 %v364_v15, %v363_v14  ;;  %s4358_s14 = smov (!%p356_p4, %s3363_s14), 1 }
  0x13   : > { %2836 = vmatmul.mubr.msk.bf16.vlgmr.msra.gmra.mrb[0].mxu0 %vm4318_vm0, %v365_v13  ;;  %2956 = vmatprep.mubr.msk.f32.mxu1 %vm4318_vm0, %v363_v14 }
  0x14   : > { %440 = vmatprep.mubr.bf16.mxu0 %v3287_v4 }
  0x16   : > { %2957 = vmatmul.mubr.msk.f32.gmra.mrb[2].mxu1 %vm4318_vm0, %v364_v15 }
  0x1b   : > { %2837 = vmatmul.mubr.msk.bf16.gmra.mrb[4].mxu0 %vm4318_vm0, %v366_v16 }
  0xe5   : > { %v2955_v28 = vpop.f32.mrb[0].mxu1 }
  0xe6   : > { %v3410_v21 = vpop.f32.mrb[0].mxu0  ;;  %v755_v35 = vpop.f32.mrb[1].mxu1  ;;  %v3456_v40 = vadd.f32 %v2955_v28, %v2843_v24 }
  0xe7   : > { %v3418_v23 = vpop.f32.mrb[1].mxu0  ;;  %v528_v26 = vrot.slane %v3410_v21, 7  ;;  %v566_v30 = vrot.slane %v3410_v21, 6  ;;  %v604_v36 = vrot.slane %v3410_v21, 5  ;;  %v3472_v45 = vadd.f32 %v2843_v24, %v755_v35 }
  0xe8   : > { %v3432_v27 = vpop.f32.mrb[2].mxu0  ;;  %v779_v56 = vmin.f32 %v3456_v40, 20.0 }
  0xe9   : > { %v515_v31 = vmul.f32 %v3415_v22, %v3432_v27  ;;  %v529_v32 = vrot.slane %v3432_v27, 7  ;;  %v567_v33 = vrot.slane %v3432_v27, 6  ;;  %v3442_v34 = vpop.f32.mrb[3].mxu0  ;;  %v605_v39 = vrot.slane %v3432_v27, 5  ;;  %v2958_v49 = vpop.f32.mrb[2].mxu1 }
  0xea   : > { %v765_v54 = vpop.f32.mrb[3].mxu1  ;;  %v778_v59 = vmin.f32 %v3472_v45, 20.0  ;;  %v3493_v60 = vadd.f32 %v2958_v49, %v2843_v24  ;;  %v784_v63 = vmul.f32 1.442695, %v779_v56  ;;  %v3522_v27 = vand.u32 7, %v459_v7 }
  0xeb   : > { %v525_v41 = vadd.f32 %v3429_v25, %v515_v31  ;;  %v535_v42 = vsel %vm532_vm1, %v528_v26, %v529_v32  ;;  %v573_v43 = vsel %vm4321_vm3, %v566_v30, %v567_v33  ;;  %v611_v48 = vsel %vm608_vm4, %v604_v36, %v605_v39 }
  0xec   : > { %v550_v46 = vsel %vm538_vm2, %v535_v42, 0.0  ;;  %v588_v47 = vsel %vm4320_vm5, %v573_v43, 0.0  ;;  %v626_v53 = vsel %vm614_vm6, %v611_v48, 0.0  ;;  %v3495_v61 = vadd.f32 %v2843_v24, %v765_v54 }
  0xed   : > { %v559_v51 = vmul.f32 %v3448_v37, %v550_v46  ;;  %v597_v52 = vmul.f32 %v3453_v38, %v588_v47  ;;  %v635_v55 = vmul.f32 %v3470_v44, %v626_v53  ;;  %v782_v5 = vmul.f32 1.442695, %v778_v59 }
  0xee   : > { %v3490_v57 = vpop.f32.mrb[4].mxu0  ;;  %v781_v6 = vmin.f32 %v3493_v60, 20.0  ;;  %3183 = vpow2.f32 %v784_v63  ;;  %v780_v9 = vmin.f32 %v3495_v61, 20.0  ;;  %vm540_vm10 = vcmp.ge.s32.totalorder %v3522_v27, 1 }
  0xef   : > { %v563_v58 = vadd.f32 %v559_v51, %v525_v41  ;;  %v3497_v62 = vpop.f32.mrb[5].mxu0  ;;  %v516_v0 = vmul.f32 %v3415_v22, %v3490_v57  ;;  %v530_v1 = vrot.slane %v3490_v57, 7  ;;  %3185 = vpow2.f32 %v782_v5 }
  0xf0   : > { %v3503_v2 = vpop.f32.mrb[6].mxu0  ;;  %v788_v12 = vmul.f32 1.442695, %v781_v6  ;;  %v786_v14 = vmul.f32 1.442695, %v780_v9  ;;  %v568_v16 = vrot.slane %v3490_v57, 6 }
  0xf1   : > { %v601_v3 = vadd.f32 %v597_v52, %v563_v58  ;;  %v3507_v8 = vpop.f32.mrb[7].mxu0  ;;  %v526_v10 = vadd.f32 %v3429_v25, %v516_v0  ;;  %v534_v13 = vsel %vm532_vm1, %v529_v32, %v530_v1  ;;  %v606_v19 = vrot.slane %v3490_v57, 5 }
  0xf2   : > { %v551_v15 = vsel %vm539_vm7, %v534_v13, 0.0  ;;  %3187 = vpow2.f32 %v788_v12  ;;  %v572_v28 = vsel %vm4321_vm3, %v567_v33, %v568_v16  ;;  %v517_v31 = vmul.f32 %v3415_v22, %v3503_v2 }
  0xf3   : > { %v3512_v11 = vadd.f32 %v635_v55, %v601_v3  ;;  %v560_v24 = vmul.f32 %v3448_v37, %v551_v15  ;;  %3189 = vpow2.f32 %v786_v14  ;;  %v610_v29 = vsel %vm608_vm4, %v605_v39, %v606_v19 }
  0xf4   : > { %v589_v35 = vsel %vm4319_vm8, %v572_v28, 0.0  ;;  %v3535_v41 = vand.u32 7, %v3405_v18  ;;  %v627_v43 = vsel %vm615_vm9, %v610_v29, 0.0  ;;  %v527_v33 = vadd.f32 %v3429_v25, %v517_v31 }
  0xf5   : > { %v564_v32 = vadd.f32 %v560_v24, %v526_v10  ;;  %v598_v42 = vmul.f32 %v3453_v38, %v589_v35  ;;  %v636_v46 = vmul.f32 %v3470_v44, %v627_v43  ;;  %v531_v47 = vrot.slane %v3503_v2, 7 }
  0xf6   : > { %v569_v39 = vrot.slane %v3503_v2, 6  ;;  %vm537_vm11 = vcmp.ge.s32.totalorder %v3535_v41, 1  ;;  %vm575_vm12 = vcmp.ge.s32.totalorder %v3535_v41, 2  ;;  %vm578_vm13 = vcmp.ge.s32.totalorder %v3522_v27, 2 }
  0xf7   : > { %v602_v48 = vadd.f32 %v598_v42, %v564_v32  ;;  %v533_v49 = vsel %vm532_vm1, %v530_v1, %v531_v47  ;;  %v536_v51 = vsel %vm532_vm1, %v531_v47, %v528_v26  ;;  %v514_v26 = vmul.f32 %v3415_v22, %v3410_v21 }
  0xf8   : > { %v3184_v52 = vpop.eup %3183  ;;  %v552_v54 = vsel %vm540_vm10, %v533_v49, 0.0  ;;  %v571_v55 = vsel %vm4321_vm3, %v568_v16, %v569_v39  ;;  %v549_v0 = vsel %vm537_vm11, %v536_v51, 0.0  ;;  %vm613_vm14 = vcmp.ge.s32.totalorder %v3535_v41, 3 }
  0xf9   : > { %v3550_v53 = vadd.f32 %v636_v46, %v602_v48  ;;  %v3186_v56 = vpop.eup %3185  ;;  %v799_v58 = vadd.f32 1.0, %v3184_v52  ;;  %v802_v59 = vmul.f32 -0.5, %v3184_v52  ;;  %v805_v6 = vand.u32 2147483647, %v3184_v52 }
  0xfa   : > { %v790_v63 = vadd.f32 1.0, %v3186_v56  ;;  %v793_v7 = vmul.f32 -0.5, %v3186_v56  ;;  %v558_v10 = vmul.f32 %v3448_v37, %v549_v0  ;;  %vm616_vm15 = vcmp.ge.s32.totalorder %v3522_v27, 3 }
  0xfb   : > { %3191 = vlog2.f32 %v799_v58  ;;  %v803_v12 = vadd.f32 1.0, %v802_v59  ;;  %v524_v22 = vadd.f32 %v3429_v25, %v514_v26  ;;  %v607_v14 = vrot.slane %v3503_v2, 5 }
  0xfc   : > { %v3188_v1 = vpop.eup %3187  ;;  %3193 = vlog2.f32 %v790_v63  ;;  %vm775_vm6 = vcmp.gt.f32.partialorder %v3456_v40, 20.0  ;;  %vm774_vm9 = vcmp.gt.f32.partialorder %v3472_v45, 20.0  ;;  %v561_v16 = vmul.f32 %v3448_v37, %v552_v54 }
  0xfd   : > { %v3190_v3 = vpop.eup %3189  ;;  %v817_v5 = vadd.f32 1.0, %v3188_v1  ;;  %v820_v13 = vmul.f32 -0.5, %v3188_v1  ;;  %vm3570_vm0 = vcmp.lt.f32.partialorder %v805_v6, 0.0004427343  ;;  %v794_v28 = vadd.f32 1.0, %v793_v7 }
  0xfe   : > { %v808_v9 = vadd.f32 1.0, %v3190_v3  ;;  %v811_v15 = vmul.f32 -0.5, %v3190_v3  ;;  %v796_v29 = vand.u32 2147483647, %v3186_v56  ;;  %vm777_vm8 = vcmp.gt.f32.partialorder %v3493_v60, 20.0 }
  0xff   : > { %3195 = vlog2.f32 %v817_v5  ;;  %v562_v25 = vadd.f32 %v558_v10, %v524_v22  ;;  %v804_v31 = vmul.f32 %v3184_v52, %v803_v12  ;;  %v823_v32 = vand.u32 2147483647, %v3188_v1 }
 0x100   : > { %3197 = vlog2.f32 %v808_v9  ;;  %vm776_vm5 = vcmp.gt.f32.partialorder %v3495_v61, 20.0  ;;  %v565_v2 = vadd.f32 %v561_v16, %v527_v33  ;;  %v574_v35 = vsel %vm4321_vm3, %v569_v39, %v566_v30 }
 0x101   : > { %v821_v37 = vadd.f32 1.0, %v820_v13  ;;  %v587_v42 = vsel %vm575_vm12, %v574_v35, 0.0  ;;  %v590_v43 = vsel %vm578_vm13, %v571_v55, 0.0  ;;  %v609_v46 = vsel %vm608_vm4, %v606_v19, %v607_v14 }
 0x102   : > { %v812_v47 = vadd.f32 1.0, %v811_v15  ;;  %v814_v48 = vand.u32 2147483647, %v3190_v3  ;;  %v596_v33 = vmul.f32 %v3453_v38, %v587_v42  ;;  %v599_v49 = vmul.f32 %v3453_v38, %v590_v43 }
 0x103   : > { %v795_v30 = vmul.f32 %v3186_v56, %v794_v28  ;;  %vm3590_vm3 = vcmp.lt.f32.partialorder %v796_v29, 0.0004427343  ;;  %v612_v57 = vsel %vm608_vm4, %v607_v14, %v604_v36  ;;  %v628_v19 = vsel %vm616_vm15, %v609_v46, 0.0  ;;  %v2848_v56 = vld [vmem:[%s4312_s5] ss:$0 sm:$0xff] }
 0x104   : > { %v600_v55 = vadd.f32 %v596_v33, %v562_v25  ;;  %v603_v58 = vadd.f32 %v599_v49, %v565_v2  ;;  %v625_v38 = vsel %vm613_vm14, %v612_v57, 0.0  ;;  %v822_v63 = vmul.f32 %v3188_v1, %v821_v37 }
 0x105   : > { %v3192_v51 = vpop.eup %3191  ;;  %v634_v21 = vmul.f32 %v3470_v44, %v625_v38  ;;  %v637_v36 = vmul.f32 %v3470_v44, %v628_v19  ;;  %vm3609_vm4 = vcmp.lt.f32.partialorder %v823_v32, 0.0004427343  ;;  %v813_v6 = vmul.f32 %v3190_v3, %v812_v47 }
 0x106   : > { %v3194_v52 = vpop.eup %3193  ;;  %v801_v54 = vmul.f32 0.6931472, %v3192_v51  ;;  %vm3613_vm14 = vcmp.lt.f32.partialorder %v814_v48, 0.0004427343  ;;  %vm885_vm15 = vcmp.ge.s32.totalorder %v3522_v27, 4 }
 0x107   : > { %v792_v59 = vmul.f32 0.6931472, %v3194_v52  ;;  %v3624_v12 = vadd.f32 %v634_v21, %v600_v55  ;;  %v3632_v14 = vadd.f32 %v637_v36, %v603_v58 }
 0x108   : > { %v807_v26 = vsel %vm3570_vm0, %v804_v31, %v801_v54  ;;  %vm4330_vm0 = vcmp.lt.s32.totalorder %v3405_v18, 2 }
 0x109   : > { %v3196_v0 = vpop.eup %3195  ;;  %v3620_v1 = vsel %vm775_vm6, %v3456_v40, %v807_v26  ;;  %v798_v44 = vsel %vm3590_vm3, %v795_v30, %v792_v59  ;;  %v642_v16 = vsub.f32 0.0, %v3624_v12  ;;  %vm4333_vm3 = vmmov %vm4330_vm0  ;;  %vm1027_vm6 = vcmask 130048  }
 0x10a   : > { %v3198_v9 = vpop.eup %3197  ;;  %v819_v10 = vmul.f32 0.6931472, %v3196_v0  ;;  %v838_v22 = vmul.f32 %v2848_v56, %v3620_v1  ;;  %v3630_v3 = vsel %vm774_vm9, %v3472_v45, %v798_v44  ;;  %vm1095_vm9 = vcmask 1043456  }
 0x10b   : > { %v810_v13 = vmul.f32 0.6931472, %v3198_v9  ;;  %v837_v15 = vmul.f32 %v2848_v56, %v3630_v3  ;;  %v646_v2 = vmul.f32 1.442695, %v642_v16 }
 0x10c   : > { %v825_v40 = vsel %vm3609_vm4, %v822_v63, %v819_v10  ;;  %v842_v45 = vrot.slane %v838_v22, 7 }
 0x10d   : > { %v3641_v24 = vsel %vm777_vm8, %v3493_v60, %v825_v40  ;;  %v816_v28 = vsel %vm3613_vm14, %v813_v6, %v810_v13  ;;  %v841_v29 = vrot.slane %v837_v15, 7  ;;  %3199 = vpow2.f32 %v646_v2 }
 0x10e   : > { %v840_v25 = vmul.f32 %v2848_v56, %v3641_v24  ;;  %v3649_v31 = vsel %vm776_vm5, %v3495_v61, %v816_v28  ;;  %vm4334_vm5 = vcmp.ge.s32.totalorder %v3408_v20, 2  ;;  %vm877_vm8 = vcmp.lt.s32.totalorder %v3405_v18, 4 }
 0x10f   : > { %v839_v32 = vmul.f32 %v2848_v56, %v3649_v31  ;;  %v847_v35 = vsel %vm532_vm1, %v841_v29, %v842_v45  ;;  %v3290_v2 = vmov 1   ;;  %vm1091_vm14 = vcmask 64512  }
 0x110   : > { %v844_v60 = vrot.slane %v840_v25, 7  ;;  %v850_v37 = vsel %vm538_vm2, %v847_v35, 0.0  ;;  %vm4332_vm2 = vmmov %vm4330_vm0 }
 0x111   : > { %v843_v42 = vrot.slane %v839_v32, 7  ;;  %v854_v43 = vadd.f32 %v850_v37, %v838_v22 }
 0x112   : > { %v848_v46 = vsel %vm532_vm1, %v844_v60, %v841_v29 }
 0x113   : > { %v846_v61 = vsel %vm532_vm1, %v842_v45, %v843_v42  ;;  %v845_v47 = vsel %vm532_vm1, %v843_v42, %v844_v60  ;;  %v849_v48 = vsel %vm537_vm11, %v848_v46, 0.0  ;;  %v858_v49 = vrot.slane %v854_v43, 6  ;;  %vm4331_vm1 = vmmov %vm4330_vm0 }
 0x114   : > { %v851_v33 = vsel %vm539_vm7, %v846_v61, 0.0  ;;  %v852_v51 = vsel %vm540_vm10, %v845_v47, 0.0  ;;  %v853_v30 = vadd.f32 %v849_v48, %v837_v15  ;;  %vm4335_vm7 = vcmp.ge.s32.totalorder %v3482_v50, 2 }
 0x115   : > { %v855_v39 = vadd.f32 %v851_v33, %v839_v32  ;;  %v856_v57 = vadd.f32 %v852_v51, %v840_v25  ;;  %vm882_vm10 = vcmp.ge.s32.totalorder %v3535_v41, 4  ;;  %vm884_vm11 = vcmp.ge.s32.totalorder %v3482_v50, 4 }
 0x116   : > { %v857_v19 = vrot.slane %v853_v30, 6  ;;  %v3288_v41 = vmov 0.0   ;;  %v643_v61 = vsub.f32 0.0, %v3512_v11 }
 0x117   : > { %v859_v52 = vrot.slane %v855_v39, 6  ;;  %v860_v54 = vrot.slane %v856_v57, 6  ;;  %v3200_v0 = vpop.eup %3199  ;;  %2959 = vmatprep.subr.bf16.mxu1 %v3288_v41  ;;  %2965 = vmatprep.subr.bf16.mxu0 %v3288_v41 }
 0x118   : > { %v863_v55 = vsel %vm4330_vm0, %v857_v19, %v858_v49  ;;  %v654_v9 = vadd.f32 1.0, %v3200_v0  ;;  %v648_v47 = vmul.f32 1.442695, %v643_v61  ;;  %vm1398_vm0 = vcmask 392192  }
 0x119   : > { %v862_v58 = vsel %vm4331_vm1, %v858_v49, %v859_v52  ;;  %v861_v38 = vsel %vm4332_vm2, %v859_v52, %v860_v54  ;;  %v864_v56 = vsel %vm4333_vm3, %v860_v54, %v857_v19  ;;  %v866_v59 = vsel %vm4334_vm5, %v863_v55, 0.0 }
 0x11a   : > { %v867_v63 = vsel %vm4335_vm7, %v862_v58, 0.0  ;;  %v865_v21 = vsel %vm575_vm12, %v864_v56, 0.0  ;;  %v868_v36 = vsel %vm578_vm13, %v861_v38, 0.0  ;;  %v870_v6 = vadd.f32 %v866_v59, %v854_v43 }
 0x11b   : > { %v872_v26 = vadd.f32 %v868_v36, %v856_v57  ;;  %v869_v5 = vadd.f32 %v865_v21, %v853_v30  ;;  %v871_v7 = vadd.f32 %v867_v63, %v855_v39  ;;  %3201 = vrcp.f32 %v654_v9 }
 0x11c   : > { %v874_v22 = vrot.slane %v870_v6, 4  ;;  %vm3289_vm12 = vmmov 0   ;;  %vm883_vm13 = vcmp.ge.s32.totalorder %v3408_v20, 4  ;;  %v3296_v20 = vmov 3  }
 0x11d   : > { %v876_v44 = vrot.slane %v872_v26, 4  ;;  %v873_v10 = vrot.slane %v869_v5, 4  ;;  %v875_v13 = vrot.slane %v871_v7, 4  ;;  %2961 = vmatprep.mubr.msk.bf16.mxu1 %vm3289_vm12, %v3288_v41  ;;  %2967 = vmatprep.mubr.msk.bf16.mxu0 %vm3289_vm12, %v3288_v41  ;;  %3203 = vpow2.f32 %v648_v47 }
 0x11e   : > { %vm4338_vm1 = vcmask 261120  }
 0x11f   : > { %v881_v15 = vsel %vm877_vm8, %v876_v44, %v873_v10  ;;  %v879_v16 = vsel %vm877_vm8, %v874_v22, %v875_v13  ;;  %v880_v35 = vsel %vm877_vm8, %v873_v10, %v874_v22  ;;  %v878_v42 = vsel %vm877_vm8, %v875_v13, %v876_v44  ;;  %vm4339_vm2 = vmmov %vm4338_vm1 }
 0x120   : > { %v894_v40 = vsel %vm882_vm10, %v881_v15, 0.0  ;;  %v896_v45 = vsel %vm884_vm11, %v879_v16, 0.0  ;;  %v895_v60 = vsel %vm883_vm13, %v880_v35, 0.0  ;;  %v897_v43 = vsel %vm885_vm15, %v878_v42, 0.0  ;;  %vm4340_vm3 = vmmov %vm4338_vm1 }
 0x121   : > { %v3691_v28 = vadd.f32 %v894_v40, %v869_v5  ;;  %v3693_v29 = vadd.f32 %v896_v45, %v871_v7  ;;  %v3725_v37 = vadd.f32 %v895_v60, %v870_v6  ;;  %v3732_v46 = vadd.f32 %v897_v43, %v872_v26  ;;  %vm4341_vm5 = vmmov %vm4338_vm1 }
 0x122   : > { %v1081_v15 = vsub.s32 0, %v3405_v18  ;;  %v1145_v60 = vsub.s32 1, %v3405_v18  ;;  %vm4342_vm7 = vmmov %vm4338_vm1 }
 0x123   : > { %1076 = vperm.xlu1 %3146, %v3691_v28   ;;  %vm4343_vm8 = vmmov %vm4338_vm1 }
 0x124   : > { %vm4344_vm10 = vmmov %vm4338_vm1 }
 0x125   : > { %v3202_v50 = vpop.eup %3201  ;;  %vm4345_vm11 = vmmov %vm4338_vm1 }
 0x126   : > { %v3704_v25 = vmul.f32 %v3202_v50, %v3624_v12  ;;  %v3295_v12 = vmov 2   ;;  %vm4347_vm13 = vmmov %vm4338_vm1 }
 0x127   : > { %936 = vperm.xlu1 %3146, %v3630_v3   ;;  %v3204_v39 = vpop.eup %3203  ;;  %vm4348_vm15 = vmmov %vm4338_vm1 }
 0x128   : > { %v1021_v32 = vpack.c.bf16 %v3704_v25, %v3704_v25  ;;  %v655_v19 = vadd.f32 1.0, %v3204_v39 }
 0x12a   : > { %1025 = vrot.lane.b32.xlu0 %v1021_v32, %s3291_s12  ;;  %3205 = vrcp.f32 %v655_v19 }
 0x12b   : > { %3147 = vset.pattern.permute.xlu1 %v3290_v2 }
 0x12c   : > { %1206 = vrot.lane.b32.xlu1 %v1021_v32, %s3292_s15 }
 0x12e   : > { %1023 = vrot.lane.b32.xlu0 %v1021_v32, %s3293_s16 }
 0x130   : > { %1204 = vrot.lane.b32.xlu1 %v1021_v32, %s3294_s18 }
 0x134   : > { %959 = vperm.xlu1 %3147, %v3630_v3   ;;  %v3206_v56 = vpop.eup %3205 }
 0x135   : > { %v3756_v21 = vmul.f32 %v3206_v56, %v3512_v11 }
 0x137   : > { %v1400_v0 = vpack.c.bf16 %v3756_v21, %v3756_v21 }
 0x138   : > { %3148 = vset.pattern.permute.xlu1 %v3295_v12 }
 0x139   : > { %979 = vperm.xlu1 %3148, %v3630_v3  }
 0x13d   : > { %3149 = vset.pattern.permute.xlu1 %v3290_v2 }
 0x13e   : > { %1140 = vperm.xlu1 %3149, %v3691_v28  }
 0x142   : > { %3150 = vset.pattern.permute.xlu1 %v3295_v12 }
 0x143   : > { %1255 = vperm.xlu1 %3150, %v3691_v28  }
 0x147   : > { %3151 = vset.pattern.permute.xlu1 %v3287_v4 }
 0x14c   : > { %902 = vxpose.xlu0.b32.start [1/4] (short) (narrow) %v3691_v28, 8 }
 0x150   : > { %903 = vxpose.xlu0.b32.cont [2/4] (short) (narrow) %v3725_v37, 8 }
 0x154   : > { %904 = vxpose.xlu0.b32.cont [3/4] (short) (narrow) %v3693_v29, 8 }
 0x158   : > { %905 = vxpose.xlu0.b32.end [4/4] (short) (narrow) %v3732_v46, 8 }
 0x181   : > { %3152 = vset.pattern.permute.xlu0 %v3296_v20 }
 0x182   : > { %999 = vperm.xlu0 %3152, %v3630_v3  }
 0x19c   : > { %v1026_v27 = vpop.permute.xlu0 %1025 }
 0x19d   : > { %v1032_v48 = vsel %vm1027_vm6, %v1026_v27, 0 }
 0x19e   : > { %2960 = vmatpush3.bf16.xpose.msra.mxu1 %v1032_v48 }
 0x19f   : > { %2971 = vmatprep.subr.bf16.mxu1 %v3288_v41 }
 0x1a0   : > { %v1024_v51 = vpop.permute.xlu0 %1023 }
 0x1a2   : > { %v3739_v33 = vpop.permute.xlu1 %1076 }
 0x1a5   : > { %2962 = vmatmul.mubr.msk.bf16.vlgmr.msra.gmra.mrb[4].mxu1 %vm1027_vm6, %v1024_v51 }
 0x1a6   : > { %v937_v49 = vpop.permute.xlu1 %936  ;;  %2973 = vmatprep.mubr.msk.bf16.mxu1 %vm3289_vm12, %v3288_v41 }
 0x1a7   : > { %v954_v30 = vmul.f32 %v937_v49, %v3704_v25 }
 0x1a9   : > { %v1090_v3 = vpack.c.bf16 %v954_v30, %v954_v30 }
 0x1aa   : > { %v3746_v57 = vpop.permute.xlu1 %1206 }
 0x1ab   : > { %v1097_v52 = vsel %vm1095_vm9, %v1090_v3, 0 }
 0x1ac   : > { %2966 = vmatpush3.bf16.msra.mxu0 %v1097_v52 }
 0x1ad   : > { %2977 = vmatprep.subr.bf16.mxu0 %v3288_v41 }
 0x1ae   : > { %v3750_v54 = vpop.permute.xlu1 %1204 }
 0x1b3   : > { %v960_v55 = vpop.permute.xlu1 %959 }
 0x1b4   : > { %v974_v58 = vmul.f32 %v960_v55, %v3704_v25 }
 0x1b6   : > { %v1154_v38 = vpack.c.bf16 %v974_v58, %v974_v58 }
 0x1b8   : > { %1156 = vrot.lane.b32.xlu1 %v1154_v38, %s3297_s17  ;;  %v980_v59 = vpop.permute.xlu1 %979 }
 0x1b9   : > { %v994_v63 = vmul.f32 %v980_v59, %v3704_v25 }
 0x1bb   : > { %v1269_v36 = vpack.c.bf16 %v994_v63, %v994_v63 }
 0x1bd   : > { %1271 = vrot.lane.b32.xlu1 %v1269_v36, %s3298_s19  ;;  %v1141_v7 = vpop.permute.xlu1 %1140 }
 0x1c1   : > { %1404 = vrot.lane.b32.xlu1 %v1400_v0, %s3291_s12 }
 0x1c2   : > { %v3773_v9 = vpop.permute.xlu1 %1255 }
 0x1c5   : > { %1402 = vrot.lane.b32.xlu1 %v1400_v0, %s3293_s16 }
 0x1c9   : > { %1454 = vperm.xlu1 %3151, %v3725_v37  }
 0x1cc   : > { %v3769_v11 = vpop.trf.xlu0 }
 0x1cd   : > { %3153 = vset.pattern.permute.xlu1 %v3296_v20  ;;  %v3783_v16 = vrot.slane %v3769_v11, %v1081_v15  ;;  %v3790_v42 = vrot.slane %v3769_v11, %v1145_v60 }
 0x1ce   : > { %1320 = vperm.xlu1 %3153, %v3691_v28  }
 0x1cf   : > { %v1147_v43 = vsub.f32 %v1141_v7, %v3790_v42  ;;  %v1083_v61 = vsub.f32 %v3739_v33, %v3783_v16  ;;  %v1019_v33 = vand.u32 127, %v455_v17  ;;  %v644_v7 = vsub.f32 0.0, %v3550_v53 }
 0x1d1   : > { %v1148_v47 = vmin.f32 %v1147_v43, 0.0  ;;  %v1084_v27 = vmin.f32 %v1083_v61, 0.0  ;;  %vm3806_vm4 = vcmp.le.s32.totalorder %v1019_v33, %v3405_v18 }
 0x1d2   : > { %3154 = vset.pattern.permute.xlu1 %v3287_v4 }
 0x1d3   : > { %941 = vperm.xlu1 %3154, %v3620_v1   ;;  %v1149_v48 = vmul.f32 1.442695, %v1148_v47  ;;  %v1085_v49 = vmul.f32 1.442695, %v1084_v27 }
 0x1d7   : > { %3155 = vset.pattern.permute.xlu1 %v3290_v2 }
 0x201   : > { %v1000_v26 = vpop.permute.xlu0 %999 }
 0x202   : > { %v1014_v5 = vmul.f32 %v1000_v26, %v3704_v25 }
 0x204   : > { %v1334_v6 = vpack.c.bf16 %v1014_v5, %v1014_v5 }
 0x206   : > { %1336 = vrot.lane.b32.xlu1 %v1334_v6, %s3299_s20 }
 0x22a   : > { %v1157_v44 = vpop.permute.xlu1 %1156 }
 0x22b   : > { %v1162_v10 = vsel %vm1095_vm9, %v1157_v44, 0 }
 0x22c   : > { %2972 = vmatpush3.bf16.msra.mxu1 %v1162_v10  ;;  %v650_v10 = vmul.f32 1.442695, %v644_v7 }
 0x22d   : > { %2983 = vmatprep.subr.bf16.mxu1 %v3288_v41 }
 0x22f   : > { %v1272_v22 = vpop.permute.xlu1 %1271 }
 0x230   : > { %v1277_v26 = vsel %vm1095_vm9, %v1272_v22, 0 }
 0x233   : > { %v3777_v13 = vpop.permute.xlu1 %1404 }
 0x237   : > { %v3780_v40 = vpop.permute.xlu1 %1402 }
 0x248   : > { %v1455_v28 = vpop.permute.xlu1 %1454 }
 0x249   : > { %v1457_v45 = vsub.f32 %v1455_v28, %v3783_v16 }
 0x24b   : > { %v1458_v50 = vmin.f32 %v1457_v45, 0.0  ;;  %v1260_v45 = vsub.s32 2, %v3405_v18 }
 0x24d   : > { %v1459_v32 = vmul.f32 1.442695, %v1458_v50  ;;  %v3810_v19 = vpop.permute.xlu1 %1320  ;;  %v3845_v60 = vrot.slane %v3769_v11, %v1260_v45 }
 0x24f   : > { %3207 = vpow2.f32 %v1459_v32 }
 0x250   : > { %3209 = vpow2.f32 %v1149_v48 }
 0x251   : > { %3211 = vpow2.f32 %v1085_v49 }
 0x252   : > { %v3821_v5 = vpop.permute.xlu1 %941  ;;  %3213 = vpow2.f32 %v650_v10 }
 0x259   : > { %v3208_v35 = vpop.eup %3207 }
 0x25a   : > { %1462 = vrot.lane.b32.xlu1 %v3208_v35, %s3300_s21  ;;  %v3210_v51 = vpop.eup %3209 }
 0x25b   : > { %v3212_v30 = vpop.eup %3211 }
 0x25c   : > { %v3214_v28 = vpop.eup %3213 }
 0x25d   : > { %v656_v32 = vadd.f32 1.0, %v3214_v28 }
 0x25e   : > { %1582 = vrot.lane.b32.xlu1 %v1400_v0, %s3292_s15 }
 0x25f   : > { %3215 = vrcp.f32 %v656_v32 }
 0x262   : > { %1580 = vrot.lane.b32.xlu1 %v1400_v0, %s3294_s18  ;;  %v1212_v0 = vsel %vm1027_vm6, %v3746_v57, 0 }
 0x266   : > { %1516 = vperm.xlu1 %3155, %v3725_v37  }
 0x26a   : > { %3156 = vset.pattern.permute.xlu1 %v3295_v12 }
 0x26b   : > { %1631 = vperm.xlu1 %3156, %v3725_v37  }
 0x26f   : > { %3157 = vset.pattern.permute.xlu1 %v3290_v2 }
 0x270   : > { %963 = vperm.xlu1 %3157, %v3620_v1  }
 0x274   : > { %3158 = vset.pattern.permute.xlu1 %v3295_v12 }
 0x275   : > { %983 = vperm.xlu1 %3158, %v3620_v1  }
 0x278   : > { %v1068_v3 = vpop.f32.mrb[4].mxu1  ;;  %v1337_v57 = vpop.permute.xlu1 %1336 }
 0x279   : > { %3159 = vset.pattern.permute.xlu1 %v3287_v4  ;;  %v1087_v52 = vmul.f32 %v3212_v30, %v1068_v3  ;;  %v1151_v55 = vmul.f32 %v3210_v51, %v1068_v3  ;;  %v2963_v58 = vpop.f32.mrb[5].mxu1  ;;  %v1342_v6 = vsel %vm1095_vm9, %v1337_v57, 0  ;;  %v3216_v3 = vpop.eup %3215 }
 0x27a   : > { %v1071_v38 = vpop.f32.mrb[6].mxu1  ;;  %v3853_v58 = vmul.f32 %v3216_v3, %v3550_v53  ;;  %v1325_v53 = vsub.s32 3, %v3405_v18 }
 0x27b   : > { %v1088_v56 = vsel %vm3806_vm4, %v1087_v52, 0.0  ;;  %v1152_v17 = vsel %vm3806_vm4, %v1151_v55, 0.0  ;;  %v2964_v59 = vpop.f32.mrb[7].mxu1 }
 0x27c   : > { %v1089_v63 = vpack.c.bf16 %v1088_v56, %v1088_v56  ;;  %v1153_v36 = vpack.c.bf16 %v1152_v17, %v1152_v17  ;;  %v3859_v17 = vpack.c.bf16 %v3853_v58, %v3853_v58  ;;  %v3873_v59 = vrot.slane %v3769_v11, %v1325_v53 }
 0x27e   : > { %2968 = vmatmul.mubr.msk.bf16.vlgmr.msra.gmra.mrb[8].mxu0 %vm1091_vm14, %v1089_v63  ;;  %2974 = vmatmul.mubr.msk.bf16.vlgmr.msra.gmra.mrb[8].mxu1 %vm1091_vm14, %v1153_v36  ;;  %v1262_v63 = vsub.f32 %v3773_v9, %v3845_v60  ;;  %v955_v9 = vmul.f32 %v3821_v5, %v3756_v21  ;;  %v1410_v5 = vsel %vm1027_vm6, %v3777_v13, 0 }
 0x27f   : > { %2978 = vmatpush3.bf16.xpose.msra.mxu0 %v1212_v0  ;;  %2984 = vmatpush3.bf16.msra.mxu1 %v1277_v26 }
 0x280   : > { %2979 = vmatprep.mubr.msk.bf16.mxu0 %vm3289_vm12, %v3288_v41  ;;  %2989 = vmatprep.subr.bf16.mxu0 %v3288_v41  ;;  %v1263_v36 = vmin.f32 %v1262_v63, 0.0 }
 0x281   : > { %2985 = vmatprep.mubr.msk.bf16.mxu1 %vm3289_vm12, %v3288_v41  ;;  %2995 = vmatprep.subr.bf16.mxu1 %v3288_v41 }
 0x286   : > { %2980 = vmatmul.mubr.msk.bf16.vlgmr.msra.gmra.mrb[12].mxu0 %vm1027_vm6, %v3750_v54 }
 0x287   : > { %2990 = vmatpush3.bf16.msra.mxu0 %v1342_v6  ;;  %2991 = vmatprep.mubr.msk.bf16.mxu0 %vm3289_vm12, %v3288_v41 }
 0x288   : > { %3001 = vmatprep.subr.bf16.mxu0 %v3288_v41 }
 0x2cc   : > { %v3836_v44 = vpop.permute.xlu1 %1462 }
 0x2d0   : > { %v3838_v22 = vpop.permute.xlu1 %1582 }
 0x2d4   : > { %v3840_v15 = vpop.permute.xlu1 %1580 }
 0x2e5   : > { %v1517_v54 = vpop.permute.xlu1 %1516 }
 0x2e6   : > { %v1519_v50 = vsub.f32 %v1517_v54, %v3790_v42 }
 0x2e8   : > { %v1520_v35 = vmin.f32 %v1519_v50, 0.0 }
 0x2ea   : > { %v1521_v43 = vmul.f32 1.442695, %v1520_v35  ;;  %v1632_v61 = vpop.permute.xlu1 %1631 }
 0x2eb   : > { %v1634_v47 = vsub.f32 %v1632_v61, %v3845_v60  ;;  %v1468_v61 = vpack.c.bf16 %v955_v9, %v955_v9  ;;  %v645_v9 = vsub.f32 0.0, %v3632_v14 }
 0x2ec   : > { %3217 = vpow2.f32 %v1521_v43 }
 0x2ed   : > { %v1635_v27 = vmin.f32 %v1634_v47, 0.0 }
 0x2ef   : > { %v1636_v48 = vmul.f32 1.442695, %v1635_v27  ;;  %v964_v49 = vpop.permute.xlu1 %963 }
 0x2f0   : > { %v975_v33 = vmul.f32 %v964_v49, %v3756_v21 }
 0x2f1   : > { %3219 = vpow2.f32 %v1636_v48 }
 0x2f2   : > { %v1530_v51 = vpack.c.bf16 %v975_v33, %v975_v33 }
 0x2f4   : > { %1532 = vrot.lane.b32.xlu1 %v1530_v51, %s3297_s17  ;;  %v984_v30 = vpop.permute.xlu1 %983 }
 0x2f5   : > { %v995_v52 = vmul.f32 %v984_v30, %v3756_v21  ;;  %v1473_v30 = vsel %vm1095_vm9, %v1468_v61, 0 }
 0x2f6   : > { %v3218_v55 = vpop.eup %3217 }
 0x2f7   : > { %1524 = vrot.lane.b32.xlu0 %v3218_v55, %s3300_s21  ;;  %v1645_v38 = vpack.c.bf16 %v995_v52, %v995_v52 }
 0x2fb   : > { %v3220_v56 = vpop.eup %3219  ;;  %1647 = vrot.lane.b32.xlu0 %v1645_v38, %s3298_s19 }
 0x2fc   : > { %1639 = vrot.lane.b32.xlu1 %v3220_v56, %s3300_s21 }
 0x2ff   : > { %1779 = vrot.lane.b32.xlu0 %v3859_v17, %s3291_s12 }
 0x300   : > { %1777 = vrot.lane.b32.xlu1 %v3859_v17, %s3293_s16 }
 0x303   : > { %1696 = vperm.xlu0 %3152, %v3725_v37   ;;  %v1327_v37 = vsub.f32 %v3810_v19, %v3873_v59 }
 0x304   : > { %1829 = vperm.xlu1 %3159, %v3693_v29  }
 0x305   : > { %v1328_v0 = vmin.f32 %v1327_v37, 0.0 }
 0x307   : > { %1003 = vperm.xlu0 %3152, %v3620_v1   ;;  %v1264_v1 = vmul.f32 1.442695, %v1263_v36  ;;  %v1329_v26 = vmul.f32 1.442695, %v1328_v0 }
 0x308   : > { %946 = vperm.xlu1 %3159, %v3649_v31  }
 0x309   : > { %3221 = vpow2.f32 %v1264_v1 }
 0x30a   : > { %3223 = vpow2.f32 %v1329_v26 }
 0x30b   : > { %3161 = vset.pattern.permute.xlu0 %v3295_v12 }
 0x30c   : > { %3160 = vset.pattern.permute.xlu1 %v3290_v2 }
 0x313   : > { %v3222_v19 = vpop.eup %3221 }
 0x314   : > { %v3224_v54 = vpop.eup %3223 }
 0x351   : > { %v3879_v57 = vpop.f32.mrb[8].mxu0  ;;  %v3881_v6 = vpop.f32.mrb[8].mxu1 }
 0x352   : > { %v2969_v18 = vpop.f32.mrb[9].mxu0  ;;  %v2975_v7 = vpop.f32.mrb[9].mxu1 }
 0x353   : > { %v1136_v11 = vpop.f32.mrb[10].mxu0  ;;  %v1201_v10 = vpop.f32.mrb[10].mxu1 }
 0x354   : > { %v2970_v28 = vpop.f32.mrb[11].mxu0  ;;  %v2976_v45 = vpop.f32.mrb[11].mxu1 }
 0x359   : > { %v1248_v50 = vpop.f32.mrb[12].mxu0 }
 0x35a   : > { %v1266_v32 = vmul.f32 %v3222_v19, %v1248_v50  ;;  %v1331_v35 = vmul.f32 %v3224_v54, %v1248_v50  ;;  %v2981_v43 = vpop.f32.mrb[13].mxu0  ;;  %v652_v19 = vmul.f32 1.442695, %v645_v9 }
 0x35b   : > { %v1251_v47 = vpop.f32.mrb[14].mxu0 }
 0x35c   : > { %v1267_v27 = vsel %vm3806_vm4, %v1266_v32, 0.0  ;;  %v1332_v48 = vsel %vm3806_vm4, %v1331_v35, 0.0  ;;  %v2982_v49 = vpop.f32.mrb[15].mxu0 }
 0x35d   : > { %v1268_v33 = vpack.c.bf16 %v1267_v27, %v1267_v27  ;;  %v1333_v51 = vpack.c.bf16 %v1332_v48, %v1332_v48 }
 0x35f   : > { %2986 = vmatmul.mubr.msk.bf16.vlgmr.msra.gmra.mrb[12].mxu1 %vm1091_vm14, %v1268_v33  ;;  %2992 = vmatmul.mubr.msk.bf16.vlgmr.msra.gmra.mrb[16].mxu0 %vm1091_vm14, %v1333_v51 }
 0x360   : > { %2996 = vmatpush3.bf16.xpose.msra.mxu1 %v1410_v5  ;;  %3002 = vmatpush3.bf16.msra.mxu0 %v1473_v30 }
 0x361   : > { %2997 = vmatprep.mubr.msk.bf16.mxu1 %vm3289_vm12, %v3288_v41  ;;  %3007 = vmatprep.subr.bf16.mxu1 %v3288_v41 }
 0x362   : > { %3003 = vmatprep.mubr.msk.bf16.mxu0 %vm3289_vm12, %v3288_v41  ;;  %3013 = vmatprep.subr.bf16.mxu0 %v3288_v41 }
 0x366   : > { %v1533_v3 = vpop.permute.xlu1 %1532 }
 0x367   : > { %v1538_v13 = vsel %vm1095_vm9, %v1533_v3, 0  ;;  %2998 = vmatmul.mubr.msk.bf16.vlgmr.msra.gmra.mrb[16].mxu1 %vm1027_vm6, %v3780_v40 }
 0x368   : > { %3008 = vmatpush3.bf16.msra.mxu1 %v1538_v13  ;;  %3009 = vmatprep.mubr.msk.bf16.mxu1 %vm3289_vm12, %v3288_v41 }
 0x369   : > { %3019 = vmatprep.subr.bf16.mxu1 %v3288_v41  ;;  %v3906_v52 = vpop.permute.xlu0 %1524 }
 0x36d   : > { %v3908_v55 = vpop.permute.xlu0 %1647 }
 0x36e   : > { %v3910_v38 = vpop.permute.xlu1 %1639 }
 0x371   : > { %v3912_v56 = vpop.permute.xlu0 %1779 }
 0x372   : > { %v3914_v53 = vpop.permute.xlu1 %1777 }
 0x382   : > { %v1697_v63 = vpop.permute.xlu0 %1696 }
 0x383   : > { %v1699_v37 = vsub.f32 %v1697_v63, %v3873_v59  ;;  %v1830_v40 = vpop.permute.xlu1 %1829 }
 0x384   : > { %v1832_v36 = vsub.f32 %v1830_v40, %v3783_v16 }
 0x385   : > { %v1700_v0 = vmin.f32 %v1699_v37, 0.0 }
 0x386   : > { %v1833_v1 = vmin.f32 %v1832_v36, 0.0  ;;  %v1004_v26 = vpop.permute.xlu0 %1003 }
 0x387   : > { %v1701_v18 = vmul.f32 1.442695, %v1700_v0  ;;  %v1015_v7 = vmul.f32 %v1004_v26, %v3756_v21  ;;  %v3934_v54 = vpop.permute.xlu1 %946 }
 0x388   : > { %v1834_v11 = vmul.f32 1.442695, %v1833_v1 }
 0x389   : > { %3225 = vpow2.f32 %v1701_v18  ;;  %v1710_v10 = vpack.c.bf16 %v1015_v7, %v1015_v7 }
 0x38a   : > { %3227 = vpow2.f32 %v1834_v11 }
 0x38b   : > { %1712 = vrot.lane.b32.xlu1 %v1710_v10, %s3299_s20  ;;  %3229 = vpow2.f32 %v652_v19 }
 0x38f   : > { %1957 = vrot.lane.b32.xlu1 %v3859_v17, %s3292_s15 }
 0x393   : > { %v3226_v28 = vpop.eup %3225  ;;  %1891 = vperm.xlu1 %3160, %v3693_v29  }
 0x394   : > { %1704 = vrot.lane.b32.xlu0 %v3226_v28, %s3300_s21  ;;  %v3228_v45 = vpop.eup %3227 }
 0x395   : > { %v3230_v43 = vpop.eup %3229 }
 0x396   : > { %v657_v47 = vadd.f32 1.0, %v3230_v43 }
 0x397   : > { %967 = vperm.xlu1 %3160, %v3649_v31  }
 0x398   : > { %1837 = vrot.lane.b32.xlu0 %v3228_v45, %s3297_s17  ;;  %3231 = vrcp.f32 %v657_v47 }
 0x39b   : > { %3162 = vset.pattern.permute.xlu1 %v3295_v12 }
 0x39c   : > { %987 = vperm.xlu1 %3162, %v3649_v31   ;;  %1955 = vrot.lane.b32.xlu0 %v3859_v17, %s3294_s18 }
 0x3a0   : > { %2006 = vperm.xlu0 %3161, %v3693_v29   ;;  %3164 = vset.pattern.permute.xlu1 %v3287_v4 }
 0x3a2   : > { %v3232_v37 = vpop.eup %3231 }
 0x3a3   : > { %v3953_v26 = vmul.f32 %v3232_v37, %v3632_v14 }
 0x3a4   : > { %3163 = vset.pattern.permute.xlu0 %v3296_v20 }
 0x3a5   : > { %v3958_v7 = vpack.c.bf16 %v3953_v26, %v3953_v26 }
 0x3fd   : > { %v3936_v50 = vpop.permute.xlu1 %1712 }
 0x401   : > { %v3938_v32 = vpop.permute.xlu1 %1957 }
 0x406   : > { %v3940_v35 = vpop.permute.xlu0 %1704 }
 0x40a   : > { %v3943_v27 = vpop.permute.xlu0 %1837 }
 0x40e   : > { %v3946_v30 = vpop.permute.xlu0 %1955 }
 0x412   : > { %v1892_v17 = vpop.permute.xlu1 %1891 }
 0x413   : > { %v1894_v61 = vsub.f32 %v1892_v17, %v3790_v42 }
 0x415   : > { %v1895_v48 = vmin.f32 %v1894_v61, 0.0 }
 0x416   : > { %v968_v49 = vpop.permute.xlu1 %967 }
 0x417   : > { %v1896_v33 = vmul.f32 1.442695, %v1895_v48  ;;  %v976_v51 = vmul.f32 %v968_v49, %v3853_v58 }
 0x419   : > { %3233 = vpow2.f32 %v1896_v33  ;;  %v1905_v5 = vpack.c.bf16 %v976_v51, %v976_v51 }
 0x41b   : > { %1907 = vrot.lane.b32.xlu1 %v1905_v5, %s3297_s17  ;;  %v988_v3 = vpop.permute.xlu1 %987 }
 0x41c   : > { %v996_v40 = vmul.f32 %v988_v3, %v3853_v58 }
 0x41e   : > { %v2020_v18 = vpack.c.bf16 %v996_v40, %v996_v40 }
 0x41f   : > { %v2007_v13 = vpop.permute.xlu0 %2006 }
 0x420   : > { %v2009_v63 = vsub.f32 %v2007_v13, %v3845_v60 }
 0x422   : > { %v2010_v36 = vmin.f32 %v2009_v63, 0.0 }
 0x423   : > { %v3234_v0 = vpop.eup %3233 }
 0x424   : > { %v2011_v1 = vmul.f32 1.442695, %v2010_v36  ;;  %1899 = vrot.lane.b32.xlu0 %v3234_v0, %s3297_s17 }
 0x426   : > { %3235 = vpow2.f32 %v2011_v1 }
 0x428   : > { %2022 = vrot.lane.b32.xlu0 %v2020_v18, %s3298_s19 }
 0x42c   : > { %2154 = vrot.lane.b32.xlu0 %v3958_v7, %s3291_s12 }
 0x430   : > { %v3236_v11 = vpop.eup %3235  ;;  %2071 = vperm.xlu0 %3163, %v3693_v29  }
 0x431   : > { %2014 = vrot.lane.b32.xlu1 %v3236_v11, %s3297_s17 }
 0x432   : > { %v3964_v10 = vpop.f32.mrb[12].mxu1  ;;  %v3966_v14 = vpop.f32.mrb[16].mxu0 }
 0x433   : > { %v2987_v28 = vpop.f32.mrb[13].mxu1  ;;  %v2993_v45 = vpop.f32.mrb[17].mxu0 }
 0x434   : > { %3166 = vset.pattern.permute.xlu0 %v3287_v4  ;;  %v1316_v9 = vpop.f32.mrb[14].mxu1  ;;  %v1381_v19 = vpop.f32.mrb[18].mxu0 }
 0x435   : > { %2152 = vrot.lane.b32.xlu1 %v3958_v7, %s3293_s16  ;;  %951 = vperm.xlu0 %3166, %v3641_v24   ;;  %v2988_v43 = vpop.f32.mrb[15].mxu1  ;;  %v2994_v17 = vpop.f32.mrb[19].mxu0 }
 0x439   : > { %2204 = vperm.xlu1 %3164, %v3732_v46   ;;  %3168 = vset.pattern.permute.xlu0 %v3295_v12 }
 0x43a   : > { %v1446_v29 = vpop.f32.mrb[16].mxu1 }
 0x43b   : > { %v1465_v61 = vmul.f32 %v3836_v44, %v1446_v29  ;;  %v1527_v4 = vmul.f32 %v3906_v52, %v1446_v29  ;;  %v2999_v47 = vpop.f32.mrb[17].mxu1  ;;  %v1588_v44 = vsel %vm1027_vm6, %v3838_v22, 0  ;;  %v1653_v52 = vsel %vm1095_vm9, %v3908_v55, 0 }
 0x43c   : > { %v1449_v48 = vpop.f32.mrb[18].mxu1 }
 0x43d   : > { %3165 = vset.pattern.permute.xlu1 %v3296_v20  ;;  %v1466_v49 = vsel %vm3806_vm4, %v1465_v61, 0.0  ;;  %v1528_v33 = vsel %vm3806_vm4, %v1527_v4, 0.0  ;;  %v3000_v51 = vpop.f32.mrb[19].mxu1 }
 0x43e   : > { %1007 = vperm.xlu1 %3165, %v3649_v31   ;;  %v1467_v5 = vpack.c.bf16 %v1466_v49, %v1466_v49  ;;  %v1529_v12 = vpack.c.bf16 %v1528_v33, %v1528_v33  ;;  %v1718_v31 = vsel %vm1095_vm9, %v3936_v50, 0 }
 0x440   : > { %3004 = vmatmul.mubr.msk.bf16.vlgmr.msra.gmra.mrb[20].mxu0 %vm1091_vm14, %v1467_v5  ;;  %3010 = vmatmul.mubr.msk.bf16.vlgmr.msra.gmra.mrb[20].mxu1 %vm1091_vm14, %v1529_v12 }
 0x441   : > { %3014 = vmatpush3.bf16.xpose.msra.mxu0 %v1588_v44  ;;  %3020 = vmatpush3.bf16.msra.mxu1 %v1653_v52 }
 0x442   : > { %3015 = vmatprep.mubr.msk.bf16.mxu0 %vm3289_vm12, %v3288_v41  ;;  %3025 = vmatprep.subr.bf16.mxu0 %v3288_v41 }
 0x443   : > { %3167 = vset.pattern.permute.xlu1 %v3290_v2  ;;  %3021 = vmatprep.mubr.msk.bf16.mxu1 %vm3289_vm12, %v3288_v41 }
 0x444   : > { %3031 = vmatprep.subr.bf16.mxu1 %v3288_v41 }
 0x448   : > { %3016 = vmatmul.mubr.msk.bf16.vlgmr.msra.gmra.mrb[24].mxu0 %vm1027_vm6, %v3840_v15 }
 0x449   : > { %3026 = vmatpush3.bf16.msra.mxu0 %v1718_v31  ;;  %3027 = vmatprep.mubr.msk.bf16.mxu0 %vm3289_vm12, %v3288_v41 }
 0x44a   : > { %3037 = vmatprep.subr.bf16.mxu0 %v3288_v41 }
 0x48d   : > { %v4006_v3 = vpop.permute.xlu1 %1907 }
 0x496   : > { %v4002_v22 = vpop.permute.xlu0 %1899 }
 0x49a   : > { %v4004_v55 = vpop.permute.xlu0 %2022 }
 0x49e   : > { %v4008_v13 = vpop.permute.xlu0 %2154 }
 0x4a3   : > { %v4010_v63 = vpop.permute.xlu1 %2014 }
 0x4a7   : > { %v4013_v40 = vpop.permute.xlu1 %2152 }
 0x4af   : > { %v2072_v50 = vpop.permute.xlu0 %2071 }
 0x4b0   : > { %v2074_v37 = vsub.f32 %v2072_v50, %v3873_v59 }
 0x4b2   : > { %v2075_v15 = vmin.f32 %v2074_v37, 0.0 }
 0x4b4   : > { %v2076_v36 = vmul.f32 1.442695, %v2075_v15  ;;  %v4068_v37 = vpop.permute.xlu0 %951 }
 0x4b6   : > { %3237 = vpow2.f32 %v2076_v36 }
 0x4b8   : > { %v2205_v0 = vpop.permute.xlu1 %2204 }
 0x4b9   : > { %v2207_v1 = vsub.f32 %v2205_v0, %v3783_v16 }
 0x4bb   : > { %v2208_v18 = vmin.f32 %v2207_v1, 0.0 }
 0x4bd   : > { %v2209_v11 = vmul.f32 1.442695, %v2208_v18  ;;  %v1008_v28 = vpop.permute.xlu1 %1007 }
 0x4be   : > { %v1016_v45 = vmul.f32 %v1008_v28, %v3853_v58 }
 0x4bf   : > { %3239 = vpow2.f32 %v2209_v11 }
 0x4c0   : > { %v3238_v9 = vpop.eup %3237  ;;  %v2085_v19 = vpack.c.bf16 %v1016_v45, %v1016_v45 }
 0x4c1   : > { %2079 = vrot.lane.b32.xlu1 %v3238_v9, %s3297_s17 }
 0x4c5   : > { %2087 = vrot.lane.b32.xlu1 %v2085_v19, %s3299_s20 }
 0x4c9   : > { %v3240_v43 = vpop.eup %3239  ;;  %2332 = vrot.lane.b32.xlu1 %v3958_v7, %s3292_s15 }
 0x4ca   : > { %2212 = vrot.lane.b32.xlu0 %v3240_v43, %s3301_s22 }
 0x4cd   : > { %2266 = vperm.xlu1 %3167, %v3732_v46  }
 0x4ce   : > { %2330 = vrot.lane.b32.xlu0 %v3958_v7, %s3294_s18 }
 0x4d1   : > { %3169 = vset.pattern.permute.xlu1 %v3296_v20 }
 0x4d2   : > { %2381 = vperm.xlu0 %3168, %v3732_v46   ;;  %2446 = vperm.xlu1 %3169, %v3732_v46  }
 0x4d6   : > { %991 = vperm.xlu0 %3168, %v3641_v24   ;;  %3170 = vset.pattern.permute.xlu1 %v3290_v2  ;;  %v956_v2 = vmul.f32 %v3934_v54, %v3853_v58  ;;  %v1785_v54 = vsel %vm1027_vm6, %v3912_v56, 0 }
 0x4d7   : > { %971 = vperm.xlu1 %3170, %v3641_v24  }
 0x4da   : > { %3172 = vset.pattern.permute.xlu0 %v3296_v20 }
 0x4db   : > { %3171 = vset.pattern.permute.xlu1 %v3296_v20 }
 0x4dc   : > { %1011 = vperm.xlu1 %3171, %v3641_v24   ;;  %v1843_v24 = vpack.c.bf16 %v956_v2, %v956_v2 }
 0x4de   : > { %v1848_v50 = vsel %vm1095_vm9, %v1843_v24, 0  ;;  %v2540_v24 = vsub.f32 0.0, %v3418_v23 }
 0x513   : > { %v4034_v16 = vpop.f32.mrb[20].mxu0  ;;  %v4036_v7 = vpop.f32.mrb[20].mxu1 }
 0x514   : > { %v3005_v17 = vpop.f32.mrb[21].mxu0  ;;  %v3011_v29 = vpop.f32.mrb[21].mxu1 }
 0x515   : > { %v1512_v61 = vpop.f32.mrb[22].mxu0  ;;  %v1577_v46 = vpop.f32.mrb[22].mxu1 }
 0x516   : > { %v3006_v4 = vpop.f32.mrb[23].mxu0  ;;  %v3012_v47 = vpop.f32.mrb[23].mxu1 }
 0x51b   : > { %v1624_v48 = vpop.f32.mrb[24].mxu0 }
 0x51c   : > { %v1642_v49 = vmul.f32 %v3910_v38, %v1624_v48  ;;  %v1707_v20 = vmul.f32 %v3940_v35, %v1624_v48  ;;  %v3017_v33 = vpop.f32.mrb[25].mxu0  ;;  %v1913_v38 = vsel %vm1095_vm9, %v4006_v3, 0 }
 0x51d   : > { %v1627_v51 = vpop.f32.mrb[26].mxu0 }
 0x51e   : > { %v1643_v5 = vsel %vm3806_vm4, %v1642_v49, 0.0  ;;  %v1708_v12 = vsel %vm3806_vm4, %v1707_v20, 0.0  ;;  %v3018_v44 = vpop.f32.mrb[27].mxu0  ;;  %v2544_v51 = vmul.f32 1.442695, %v2540_v24 }
 0x51f   : > { %v1644_v52 = vpack.c.bf16 %v1643_v5, %v1643_v5  ;;  %v1709_v31 = vpack.c.bf16 %v1708_v12, %v1708_v12 }
 0x521   : > { %3022 = vmatmul.mubr.msk.bf16.vlgmr.msra.gmra.mrb[24].mxu1 %vm1091_vm14, %v1644_v52  ;;  %3028 = vmatmul.mubr.msk.bf16.vlgmr.msra.gmra.mrb[28].mxu0 %vm1091_vm14, %v1709_v31 }
 0x522   : > { %3032 = vmatpush3.bf16.xpose.msra.mxu1 %v1785_v54  ;;  %3038 = vmatpush3.bf16.msra.mxu0 %v1848_v50  ;;  %v4108_v54 = vld [vmem:[%s4315_s8] ss:$0 sm:$0xff] }
 0x523   : > { %3033 = vmatprep.mubr.msk.bf16.mxu1 %vm3289_vm12, %v3288_v41  ;;  %3043 = vmatprep.subr.bf16.mxu1 %v3288_v41 }
 0x524   : > { %3039 = vmatprep.mubr.msk.bf16.mxu0 %vm3289_vm12, %v3288_v41  ;;  %3049 = vmatprep.subr.bf16.mxu0 %v3288_v41 }
 0x529   : > { %3034 = vmatmul.mubr.msk.bf16.vlgmr.msra.gmra.mrb[28].mxu1 %vm1027_vm6, %v3914_v53 }
 0x52a   : > { %3044 = vmatpush3.bf16.msra.mxu1 %v1913_v38  ;;  %3045 = vmatprep.mubr.msk.bf16.mxu1 %vm3289_vm12, %v3288_v41  ;;  %v2532_v38 = vmul.f32 %v4108_v54, %v3704_v25 }
 0x52b   : > { %3055 = vmatprep.subr.bf16.mxu1 %v3288_v41 }
 0x533   : > { %v4064_v56 = vpop.permute.xlu1 %2079 }
 0x537   : > { %v4066_v35 = vpop.permute.xlu1 %2087 }
 0x53b   : > { %v4072_v36 = vpop.permute.xlu1 %2332 }
 0x53c   : > { %v4070_v15 = vpop.permute.xlu0 %2212 }
 0x540   : > { %v4074_v0 = vpop.permute.xlu0 %2330 }
 0x54c   : > { %v2267_v3 = vpop.permute.xlu1 %2266 }
 0x54d   : > { %v2269_v53 = vsub.f32 %v2267_v3, %v3790_v42 }
 0x54f   : > { %v2270_v1 = vmin.f32 %v2269_v53, 0.0 }
 0x551   : > { %v2271_v18 = vmul.f32 1.442695, %v2270_v1  ;;  %v2447_v11 = vpop.permute.xlu1 %2446  ;;  %v2382_v28 = vpop.permute.xlu0 %2381 }
 0x552   : > { %v2449_v45 = vsub.f32 %v2447_v11, %v3873_v59  ;;  %v2384_v9 = vsub.f32 %v2382_v28, %v3845_v60 }
 0x553   : > { %3241 = vpow2.f32 %v2271_v18 }
 0x554   : > { %v2385_v19 = vmin.f32 %v2384_v9, 0.0  ;;  %v2450_v43 = vmin.f32 %v2449_v45, 0.0 }
 0x555   : > { %v992_v29 = vpop.permute.xlu0 %991 }
 0x556   : > { %v2386_v17 = vmul.f32 1.442695, %v2385_v19  ;;  %v972_v61 = vpop.permute.xlu1 %971  ;;  %v2451_v4 = vmul.f32 1.442695, %v2450_v43  ;;  %v997_v42 = vmul.f32 %v992_v29, %v3953_v26 }
 0x557   : > { %v977_v46 = vmul.f32 %v972_v61, %v3953_v26 }
 0x558   : > { %3243 = vpow2.f32 %v2386_v17  ;;  %v2395_v59 = vpack.c.bf16 %v997_v42, %v997_v42 }
 0x559   : > { %v2280_v47 = vpack.c.bf16 %v977_v46, %v977_v46  ;;  %3245 = vpow2.f32 %v2451_v4 }
 0x55a   : > { %3247 = vpow2.f32 %v2544_v51 }
 0x55b   : > { %2282 = vrot.lane.b32.xlu1 %v2280_v47, %s3297_s17  ;;  %v1012_v2 = vpop.permute.xlu1 %1011 }
 0x55c   : > { %v1017_v60 = vmul.f32 %v1012_v2, %v3953_v26 }
 0x55d   : > { %v3242_v48 = vpop.eup %3241 }
 0x55e   : > { %2274 = vrot.lane.b32.xlu0 %v3242_v48, %s3301_s22  ;;  %v2460_v49 = vpack.c.bf16 %v1017_v60, %v1017_v60  ;;  %v1963_v60 = vsel %vm1027_vm6, %v3938_v32, 0  ;;  %v2093_v32 = vsel %vm1095_vm9, %v4066_v35, 0 }
 0x55f   : > { %2397 = vrot.lane.b32.xlu1 %v2395_v59, %s3298_s19 }
 0x562   : > { %v3244_v20 = vpop.eup %3243 }
 0x563   : > { %2462 = vrot.lane.b32.xlu1 %v2460_v49, %s3299_s20  ;;  %2389 = vrot.lane.b32.xlu0 %v3244_v20, %s3301_s22  ;;  %v3246_v33 = vpop.eup %3245  ;;  %v2028_v49 = vsel %vm1095_vm9, %v4004_v55, 0  ;;  %s2831_s20 = sshll.u32 %s4358_s14, 3 }
 0x564   : > { %v3248_v12 = vpop.eup %3247  ;;  %s359_s23 = scalar_lea.vmem %s4317_s10, %s2831_s20 }
 0x567   : > { %1761 = vrot.lane.b32.xlu1 %v4036_v7, %s3294_s18  ;;  %2454 = vrot.lane.b32.xlu0 %v3246_v33, %s3301_s22  ;;  %v2552_v7 = vadd.f32 1.0, %v3248_v12 }
 0x569   : > { %3249 = vrcp.f32 %v2552_v7 }
 0x56b   : > { %1385 = vrot.lane.b32.xlu0 %v3881_v6, %s3294_s18 }
 0x56f   : > { %1389 = vrot.lane.b32.xlu0 %v3964_v10, %s3293_s16 }
 0x573   : > { %1393 = vrot.lane.b32.xlu0 %v3966_v14, %s3292_s15  ;;  %v3250_v10 = vpop.eup %3249 }
 0x574   : > { %v2564_v1 = vmul.f32 %v3250_v10, %v3418_v23 }
 0x5cd   : > { %v2283_v55 = vpop.permute.xlu1 %2282 }
 0x5d0   : > { %v4097_v5 = vpop.permute.xlu0 %2274 }
 0x5d1   : > { %v4145_v20 = vpop.permute.xlu1 %2397 }
 0x5d5   : > { %v4099_v44 = vpop.permute.xlu0 %2389  ;;  %v4147_v51 = vpop.permute.xlu1 %2462 }
 0x5d9   : > { %v4101_v52 = vpop.permute.xlu0 %2454  ;;  %v1762_v35 = vpop.permute.xlu1 %1761 }
 0x5da   : > { %v1772_v7 = vsel %vm1027_vm6, %v4034_v16, %v1762_v35 }
 0x5dd   : > { %v1386_v6 = vpop.permute.xlu0 %1385 }
 0x5de   : > { %v1396_v14 = vsel %vm1027_vm6, %v3879_v57, %v1386_v6 }
 0x5e1   : > { %v1390_v31 = vpop.permute.xlu0 %1389 }
 0x5e2   : > { %v1397_v50 = vsel %vm4338_vm1, %v1396_v14, %v1390_v31  ;;  %v2533_v31 = vmul.f32 %v4108_v54, %v3756_v21  ;;  %v957_v21 = vmul.f32 %v4068_v37, %v3953_v26  ;;  %v2160_v37 = vsel %vm1027_vm6, %v4008_v13, 0 }
 0x5e3   : > { %v2288_v13 = vsel %vm1095_vm9, %v2283_v55, 0 }
 0x5e5   : > { %v1394_v3 = vpop.permute.xlu0 %1393 }
 0x5e6   : > { %v1399_v53 = vsel %vm1398_vm0, %v1397_v50, %v1394_v3 }
 0x5e7   : > { %v2536_v18 = vadd.f32 %v2532_v38, %v1399_v53 }
 0x5e9   : > { %v4115_v11 = vmul.f32 %v2564_v1, %v2536_v18 }
 0x5f4   : > { %v1689_v28 = vpop.f32.mrb[24].mxu1  ;;  %v1754_v57 = vpop.f32.mrb[28].mxu0 }
 0x5f5   : > { %1765 = vrot.lane.b32.xlu1 %v1689_v28, %s3293_s16  ;;  %v3023_v45 = vpop.f32.mrb[25].mxu1  ;;  %v3029_v9 = vpop.f32.mrb[29].mxu0 }
 0x5f6   : > { %v1692_v19 = vpop.f32.mrb[26].mxu1  ;;  %v1757_v43 = vpop.f32.mrb[30].mxu0 }
 0x5f7   : > { %v3024_v17 = vpop.f32.mrb[27].mxu1  ;;  %v3030_v29 = vpop.f32.mrb[31].mxu0 }
 0x5f8   : > { %v2218_v29 = vpack.c.bf16 %v957_v21, %v957_v21 }
 0x5f9   : > { %1769 = vrot.lane.b32.xlu1 %v1754_v57, %s3292_s15 }
 0x5fc   : > { %v1821_v25 = vpop.f32.mrb[28].mxu1 }
 0x5fd   : > { %v1840_v61 = vmul.f32 %v3943_v27, %v1821_v25  ;;  %v1902_v23 = vmul.f32 %v4002_v22, %v1821_v25  ;;  %v3035_v46 = vpop.f32.mrb[29].mxu1  ;;  %v2541_v27 = vsub.f32 0.0, %v3442_v34 }
 0x5fe   : > { %v1824_v4 = vpop.f32.mrb[30].mxu1 }
 0x5ff   : > { %v1841_v42 = vsel %vm3806_vm4, %v1840_v61, 0.0  ;;  %v1903_v47 = vsel %vm3806_vm4, %v1902_v23, 0.0  ;;  %v3036_v2 = vpop.f32.mrb[31].mxu1  ;;  %v2546_v22 = vmul.f32 1.442695, %v2541_v27 }
 0x600   : > { %v1842_v48 = vpack.c.bf16 %v1841_v42, %v1841_v42  ;;  %v1904_v59 = vpack.c.bf16 %v1903_v47, %v1903_v47  ;;  %v2223_v47 = vsel %vm1095_vm9, %v2218_v29, 0 }
 0x601   : > { %3251 = vpow2.f32 %v2546_v22 }
 0x602   : > { %3040 = vmatmul.mubr.msk.bf16.vlgmr.msra.gmra.mrb[32].mxu0 %vm1091_vm14, %v1842_v48  ;;  %3046 = vmatmul.mubr.msk.bf16.vlgmr.msra.gmra.mrb[32].mxu1 %vm1091_vm14, %v1904_v59 }
 0x603   : > { %3050 = vmatpush3.bf16.xpose.msra.mxu0 %v1963_v60  ;;  %3056 = vmatpush3.bf16.msra.mxu1 %v2028_v49 }
 0x604   : > { %3051 = vmatprep.mubr.msk.bf16.mxu0 %vm3289_vm12, %v3288_v41  ;;  %3061 = vmatprep.subr.bf16.mxu0 %v3288_v41 }
 0x605   : > { %3057 = vmatprep.mubr.msk.bf16.mxu1 %vm3289_vm12, %v3288_v41  ;;  %3067 = vmatprep.subr.bf16.mxu1 %v3288_v41 }
 0x60a   : > { %3052 = vmatmul.mubr.msk.bf16.vlgmr.msra.gmra.mrb[36].mxu0 %vm1027_vm6, %v3946_v30 }
 0x60b   : > { %3062 = vmatpush3.bf16.msra.mxu0 %v2093_v32  ;;  %3063 = vmatprep.mubr.msk.bf16.mxu0 %vm3289_vm12, %v3288_v41  ;;  %v3252_v33 = vpop.eup %3251 }
 0x60c   : > { %3073 = vmatprep.subr.bf16.mxu0 %v3288_v41  ;;  %v2553_v24 = vadd.f32 1.0, %v3252_v33 }
 0x60e   : > { %3253 = vrcp.f32 %v2553_v24 }
 0x618   : > { %v3254_v12 = vpop.eup %3253 }
 0x619   : > { %v2565_v50 = vmul.f32 %v3254_v12, %v3442_v34 }
 0x667   : > { %v1766_v30 = vpop.permute.xlu1 %1765 }
 0x668   : > { %v1773_v6 = vsel %vm4339_vm2, %v1772_v7, %v1766_v30 }
 0x66b   : > { %v1770_v10 = vpop.permute.xlu1 %1769 }
 0x66c   : > { %v1774_v14 = vsel %vm1398_vm0, %v1773_v6, %v1770_v10 }
 0x66d   : > { %v2537_v38 = vadd.f32 %v2533_v31, %v1774_v14  ;;  %v2338_v31 = vsel %vm1027_vm6, %v4072_v36, 0  ;;  %v2468_v36 = vsel %vm1095_vm9, %v4147_v51, 0 }
 0x66f   : > { %v4156_v3 = vmul.f32 %v2565_v50, %v2537_v38 }
 0x671   : > { %v2573_v39 = vmul.f32 %v4156_v3, %v4156_v3 }
 0x6d5   : > { %v4158_v53 = vpop.f32.mrb[32].mxu0  ;;  %v1949_v1 = vpop.f32.mrb[32].mxu1 }
 0x6d6   : > { %2136 = vrot.lane.b32.xlu0 %v1949_v1, %s3294_s18  ;;  %v3041_v18 = vpop.f32.mrb[33].mxu0  ;;  %v3047_v16 = vpop.f32.mrb[33].mxu1 }
 0x6d7   : > { %v1887_v28 = vpop.f32.mrb[34].mxu0  ;;  %v1952_v57 = vpop.f32.mrb[34].mxu1 }
 0x6d8   : > { %v3042_v45 = vpop.f32.mrb[35].mxu0  ;;  %v3048_v9 = vpop.f32.mrb[35].mxu1 }
 0x6dd   : > { %v1999_v19 = vpop.f32.mrb[36].mxu0 }
 0x6de   : > { %v2017_v34 = vmul.f32 %v4010_v63, %v1999_v19  ;;  %v2082_v43 = vmul.f32 %v4064_v56, %v1999_v19  ;;  %v3053_v17 = vpop.f32.mrb[37].mxu0 }
 0x6df   : > { %v2002_v25 = vpop.f32.mrb[38].mxu0 }
 0x6e0   : > { %v2018_v61 = vsel %vm3806_vm4, %v2017_v34, 0.0  ;;  %v2083_v23 = vsel %vm3806_vm4, %v2082_v43, 0.0  ;;  %v3054_v46 = vpop.f32.mrb[39].mxu0 }
 0x6e1   : > { %v2019_v4 = vpack.c.bf16 %v2018_v61, %v2018_v61  ;;  %v2084_v42 = vpack.c.bf16 %v2083_v23, %v2083_v23 }
 0x6e3   : > { %3058 = vmatmul.mubr.msk.bf16.vlgmr.msra.gmra.mrb[36].mxu1 %vm1091_vm14, %v2019_v4  ;;  %3064 = vmatmul.mubr.msk.bf16.vlgmr.msra.gmra.mrb[40].mxu0 %vm1091_vm14, %v2084_v42 }
 0x6e4   : > { %3068 = vmatpush3.bf16.xpose.msra.mxu1 %v2160_v37  ;;  %3074 = vmatpush3.bf16.msra.mxu0 %v2223_v47 }
 0x6e5   : > { %3069 = vmatprep.mubr.msk.bf16.mxu1 %vm3289_vm12, %v3288_v41  ;;  %3079 = vmatprep.subr.bf16.mxu1 %v3288_v41 }
 0x6e6   : > { %3075 = vmatprep.mubr.msk.bf16.mxu0 %vm3289_vm12, %v3288_v41  ;;  %3085 = vmatprep.subr.bf16.mxu0 %v3288_v41 }
 0x6eb   : > { %3070 = vmatmul.mubr.msk.bf16.vlgmr.msra.gmra.mrb[40].mxu1 %vm1027_vm6, %v4013_v40  ;;  %v2572_v40 = vmul.f32 %v4115_v11, %v4115_v11 }
 0x6ec   : > { %3080 = vmatpush3.bf16.msra.mxu1 %v2288_v13  ;;  %3081 = vmatprep.mubr.msk.bf16.mxu1 %vm3289_vm12, %v3288_v41 }
 0x6ed   : > { %3091 = vmatprep.subr.bf16.mxu1 %v3288_v41 }
 0x748   : > { %v2137_v50 = vpop.permute.xlu0 %2136 }
 0x749   : > { %v2147_v51 = vsel %vm1027_vm6, %v4158_v53, %v2137_v50  ;;  %v2576_v53 = vsel %vm4341_vm5, %v2572_v40, 0.0 }
 0x7b6   : > { %v2064_v63 = vpop.f32.mrb[36].mxu1  ;;  %v2129_v56 = vpop.f32.mrb[40].mxu0 }
 0x7b7   : > { %2140 = vrot.lane.b32.xlu0 %v2064_v63, %s3293_s16  ;;  %v3059_v2 = vpop.f32.mrb[37].mxu1  ;;  %v3065_v48 = vpop.f32.mrb[41].mxu0 }
 0x7b8   : > { %v2067_v59 = vpop.f32.mrb[38].mxu1  ;;  %v2132_v60 = vpop.f32.mrb[42].mxu0 }
 0x7b9   : > { %v3060_v49 = vpop.f32.mrb[39].mxu1  ;;  %v3066_v32 = vpop.f32.mrb[43].mxu0 }
 0x7bb   : > { %2144 = vrot.lane.b32.xlu0 %v2129_v56, %s3292_s15 }
 0x7be   : > { %v2196_v27 = vpop.f32.mrb[40].mxu1 }
 0x7bf   : > { %v2215_v22 = vmul.f32 %v4070_v15, %v2196_v27  ;;  %v2277_v55 = vmul.f32 %v4097_v5, %v2196_v27  ;;  %v3071_v33 = vpop.f32.mrb[41].mxu1  ;;  %2609 = vrot.lane.b32.xlu0 %v2572_v40, %s3298_s19  ;;  %v2403_v15 = vsel %vm1095_vm9, %v4145_v20, 0  ;;  %v2542_v5 = vsub.f32 0.0, %v3497_v62  ;;  %vm4350_vm9 = vmmov %vm4338_vm1 }
 0x7c0   : > { %v2199_v24 = vpop.f32.mrb[42].mxu1  ;;  %v2543_v27 = vsub.f32 0.0, %v3507_v8 }
 0x7c1   : > { %v2216_v35 = vsel %vm3806_vm4, %v2215_v22, 0.0  ;;  %v2278_v30 = vsel %vm3806_vm4, %v2277_v55, 0.0  ;;  %v3072_v12 = vpop.f32.mrb[43].mxu1  ;;  %v2548_v20 = vmul.f32 1.442695, %v2542_v5 }
 0x7c2   : > { %v2217_v7 = vpack.c.bf16 %v2216_v35, %v2216_v35  ;;  %v2279_v6 = vpack.c.bf16 %v2278_v30, %v2278_v30  ;;  %v2550_v22 = vmul.f32 1.442695, %v2543_v27 }
 0x7c3   : > { %3255 = vpow2.f32 %v2548_v20 }
 0x7c4   : > { %3076 = vmatmul.mubr.msk.bf16.vlgmr.msra.gmra.mrb[44].mxu0 %vm1091_vm14, %v2217_v7  ;;  %3082 = vmatmul.mubr.msk.bf16.vlgmr.msra.gmra.mrb[44].mxu1 %vm1091_vm14, %v2279_v6  ;;  %v2535_v6 = vmul.f32 %v4108_v54, %v3953_v26 }
 0x7c5   : > { %3086 = vmatpush3.bf16.xpose.msra.mxu0 %v2338_v31  ;;  %3092 = vmatpush3.bf16.msra.mxu1 %v2403_v15 }
 0x7c6   : > { %3087 = vmatprep.mubr.msk.bf16.mxu0 %vm3289_vm12, %v3288_v41  ;;  %3097 = vmatprep.subr.bf16.mxu0 %v3288_v41 }
 0x7c7   : > { %3093 = vmatprep.mubr.msk.bf16.mxu1 %vm3289_vm12, %v3288_v41 }
 0x7cc   : > { %3088 = vmatmul.mubr.msk.bf16.vlgmr.msra.gmra.mrb[48].mxu0 %vm1027_vm6, %v4074_v0  ;;  %v2534_v0 = vmul.f32 %v4108_v54, %v3853_v58 }
 0x7cd   : > { %3098 = vmatpush3.bf16.msra.mxu0 %v2468_v36  ;;  %3099 = vmatprep.mubr.msk.bf16.mxu0 %vm3289_vm12, %v3288_v41  ;;  %v3256_v10 = vpop.eup %3255  ;;  %vm4346_vm12 = vmmov %vm4338_vm1 }
 0x7ce   : > { %v2554_v14 = vadd.f32 1.0, %v3256_v10  ;;  %v2579_v26 = vsel %vm4346_vm12, %v2573_v39, 0.0 }
 0x7d0   : > { %3257 = vrcp.f32 %v2554_v14 }
 0x7d1   : > { %3259 = vpow2.f32 %v2550_v22 }
 0x7da   : > { %v3258_v1 = vpop.eup %3257 }
 0x7db   : > { %v2566_v28 = vmul.f32 %v3258_v1, %v3497_v62  ;;  %v3260_v55 = vpop.eup %3259 }
 0x7dc   : > { %v2555_v33 = vadd.f32 1.0, %v3260_v55 }
 0x7de   : > { %3261 = vrcp.f32 %v2555_v33 }
 0x7e8   : > { %v3262_v30 = vpop.eup %3261 }
 0x7e9   : > { %v2567_v36 = vmul.f32 %v3262_v30, %v3507_v8 }
 0x829   : > { %v2141_v38 = vpop.permute.xlu0 %2140 }
 0x82a   : > { %v2148_v18 = vsel %vm4340_vm3, %v2147_v51, %v2141_v38  ;;  %vm2768_vm3 = vcmask 785408  }
 0x82d   : > { %v2145_v16 = vpop.permute.xlu0 %2144 }
 0x82e   : > { %v2149_v41 = vsel %vm1398_vm0, %v2148_v18, %v2145_v16  ;;  %v3180_v16 = vld [vmem:[%s4316_s9 + $0x8] sm:$0xff]  }
 0x82f   : > { %v2538_v57 = vadd.f32 %v2534_v0, %v2149_v41  ;;  %v3179_v0 = vld [vmem:[%s4316_s9] sm:$0xff]   ;;  %v3181_v41 = vld [vmem:[%s4316_s9 + $0x10] sm:$0xff]  }
 0x830   : > { %3103 = vmatprep.subr.bf16.mxu1 %v3179_v0 }
 0x831   : > { %v4222_v45 = vmul.f32 %v2566_v28, %v2538_v57  ;;  %v2610_v21 = vpop.permute.xlu0 %2609  ;;  %v3182_v28 = vld [vmem:[%s4316_s9 + $0x18] sm:$0xff]  }
 0x832   : > { %v2621_v58 = vsel %vm4342_vm7, %v2610_v21, 0.0 }
 0x833   : > { %v4226_v9 = vmul.f32 %v4222_v45, %v4222_v45 }
 0x835   : > { %2613 = vrot.lane.b32.xlu0 %v4226_v9, %s3298_s19  ;;  %v2582_v8 = vsel %vm4347_vm13, %v4226_v9, 0.0 }
 0x854   : > { %2577 = vadd.xlane.f32.xlu0 %v2576_v53 }
 0x858   : > { %2622 = vadd.xlane.f32.xlu0 %v2621_v58 }
 0x897   : > { %v2259_v19 = vpop.f32.mrb[44].mxu0  ;;  %v2324_v34 = vpop.f32.mrb[44].mxu1 }
 0x898   : > { %2511 = vrot.lane.b32.xlu1 %v2324_v34, %s3294_s18  ;;  %v3077_v62 = vpop.f32.mrb[45].mxu0  ;;  %v3083_v43 = vpop.f32.mrb[45].mxu1 }
 0x899   : > { %v2262_v17 = vpop.f32.mrb[46].mxu0  ;;  %v2327_v29 = vpop.f32.mrb[46].mxu1 }
 0x89a   : > { %v3078_v25 = vpop.f32.mrb[47].mxu0  ;;  %v3084_v61 = vpop.f32.mrb[47].mxu1 }
 0x89f   : > { %v2374_v23 = vpop.f32.mrb[48].mxu0 }
 0x8a0   : > { %v2392_v46 = vmul.f32 %v4099_v44, %v2374_v23  ;;  %v2457_v4 = vmul.f32 %v4101_v52, %v2374_v23  ;;  %v3089_v42 = vpop.f32.mrb[49].mxu0 }
 0x8a1   : > { %v2377_v37 = vpop.f32.mrb[50].mxu0 }
 0x8a2   : > { %v2393_v47 = vsel %vm3806_vm4, %v2392_v46, 0.0  ;;  %v2458_v13 = vsel %vm3806_vm4, %v2457_v4, 0.0  ;;  %v3090_v63 = vpop.f32.mrb[51].mxu0  ;;  %vm4351_vm4 = vmmov %vm4338_vm1 }
 0x8a3   : > { %v2394_v56 = vpack.c.bf16 %v2393_v47, %v2393_v47  ;;  %v2459_v2 = vpack.c.bf16 %v2458_v13, %v2458_v13 }
 0x8a5   : > { %3094 = vmatmul.mubr.msk.bf16.vlgmr.msra.gmra.mrb[48].mxu1 %vm1091_vm14, %v2394_v56  ;;  %3100 = vmatmul.mubr.msk.bf16.vlgmr.msra.gmra.mrb[52].mxu0 %vm1091_vm14, %v2459_v2  ;;  %v2874_v56 = vld [vmem:[%s4314_s7] ss:$0 sm:$0xff]  ;;  %vm2698_vm14 = vcmask 523264  }
 0x8a6   : > { %3104 = vmatpush3.bf16.msra.mxu1 %v3179_v0 }
 0x8a7   : > { %v2614_v54 = vpop.permute.xlu0 %2613  ;;  %3105 = vmatprep.subr.bf16.mxu1 %v3180_v16 }
 0x8a8   : > { %v2627_v1 = vsel %vm4348_vm15, %v2614_v54, 0.0 }
 0x8aa   : > { %3106 = vmatpush3.bf16.msra.mxu1 %v3180_v16 }
 0x8ab   : > { %3107 = vmatprep.subr.bf16.mxu1 %v3181_v41 }
 0x8ae   : > { %3108 = vmatpush3.bf16.msra.mxu1 %v3181_v41 }
 0x8af   : > { %3109 = vmatprep.subr.bf16.mxu1 %v3182_v28 }
 0x8b2   : > { %3110 = vmatpush3.bf16.msra.mxu1 %v3182_v28 }
 0x8e1   : > { %v2578_v57 = vpop.xlane.xlu0 %2577 }
 0x8e2   : > { %v2589_v58 = vmul.f32 0.03125, %v2578_v57 }
 0x8e4   : > { %v2593_v62 = vadd.f32 1e-05, %v2589_v58 }
 0x8e5   : > { %v2623_v9 = vpop.xlane.xlu0 %2622 }
 0x8e6   : > { %v2633_v53 = vmul.f32 0.03125, %v2623_v9 }
 0x90a   : > { %v2512_v24 = vpop.permute.xlu1 %2511 }
 0x90b   : > { %v2522_v12 = vsel %vm1027_vm6, %v2259_v19, %v2512_v24  ;;  %vm4349_vm6 = vmmov %vm4338_vm1  ;;  %v2637_v19 = vadd.f32 1e-05, %v2633_v53 }
 0x90d   : > { %3263 = vrsqrt.f32 %v2637_v19 }
 0x90e   : > { %3265 = vrsqrt.f32 %v2593_v62 }
 0x917   : > { %v3264_v61 = vpop.eup %3263 }
 0x918   : > { %v3266_v23 = vpop.eup %3265  ;;  %v2645_v46 = vmul.f32 %v3264_v61, %v4115_v11 }
 0x919   : > { %v2601_v42 = vmul.f32 %v3266_v23, %v4115_v11 }
 0x91b   : > { %v2649_v63 = vsel %vm4350_vm9, %v2601_v42, %v2645_v46 }
 0x978   : > { %v2439_v48 = vpop.f32.mrb[48].mxu1  ;;  %v2504_v59 = vpop.f32.mrb[52].mxu0 }
 0x979   : > { %2515 = vrot.lane.b32.xlu1 %v2439_v48, %s3293_s16  ;;  %v3095_v44 = vpop.f32.mrb[49].mxu1  ;;  %v3101_v52 = vpop.f32.mrb[53].mxu0  ;;  %v2660_v48 = vmul.f32 %v2874_v56, %v2649_v63 }
 0x97a   : > { %v2442_v60 = vpop.f32.mrb[50].mxu1  ;;  %v2507_v49 = vpop.f32.mrb[54].mxu0 }
 0x97b   : > { %v3096_v32 = vpop.f32.mrb[51].mxu1  ;;  %v3102_v40 = vpop.f32.mrb[55].mxu0 }
 0x97d   : > { %2519 = vrot.lane.b32.xlu1 %v2504_v59, %s3292_s15 }
 0x981   : > { %2611 = vrot.lane.b32.xlu1 %v2573_v39, %s3298_s19 }
 0x9eb   : > { %v2516_v35 = vpop.permute.xlu1 %2515 }
 0x9ec   : > { %v2523_v7 = vsel %vm4343_vm8, %v2522_v12, %v2516_v35 }
 0x9ef   : > { %v2520_v31 = vpop.permute.xlu1 %2519 }
 0x9f0   : > { %v2524_v15 = vsel %vm1398_vm0, %v2523_v7, %v2520_v31  ;;  %vm4352_vm0 = vmmov %vm4338_vm1 }
 0x9f1   : > { %v2539_v5 = vadd.f32 %v2535_v6, %v2524_v15  ;;  %vm4353_vm1 = vmmov %vm4352_vm0 }
 0x9f2   : > { %vm4354_vm2 = vmmov %vm4352_vm0 }
 0x9f3   : > { %v4253_v20 = vmul.f32 %v2567_v36, %v2539_v5  ;;  %v2612_v10 = vpop.permute.xlu1 %2611 }
 0x9f4   : > { %v2624_v14 = vsel %vm4344_vm10, %v2612_v10, 0.0 }
 0x9f5   : > { %2625 = vadd.xlane.f32.xlu0 %v2624_v14  ;;  %v2575_v50 = vmul.f32 %v4253_v20, %v4253_v20 }
 0x9f7   : > { %2615 = vrot.lane.b32.xlu1 %v2575_v50, %s3298_s19  ;;  %v2585_v38 = vsel %vm4345_vm11, %v2575_v50, 0.0 }
 0x9f9   : > { %2586 = vadd.xlane.f32.xlu0 %v2585_v38 }
 0xa1b   : > { %2580 = vadd.xlane.f32.xlu1 %v2579_v26 }
 0xa1f   : > { %2583 = vadd.xlane.f32.xlu1 %v2582_v8 }
 0xa23   : > { %2628 = vadd.xlane.f32.xlu1 %v2627_v1 }
 0xa69   : > { %v2616_v51 = vpop.permute.xlu1 %2615 }
 0xa6a   : > { %v2630_v18 = vsel %vm4349_vm6, %v2616_v51, 0.0 }
 0xa6b   : > { %2631 = vadd.xlane.f32.xlu0 %v2630_v18 }
 0xa82   : > { %v2626_v21 = vpop.xlane.xlu0 %2625 }
 0xa83   : > { %v2634_v34 = vmul.f32 0.03125, %v2626_v21 }
 0xa85   : > { %v2638_v43 = vadd.f32 1e-05, %v2634_v34 }
 0xa86   : > { %v2587_v49 = vpop.xlane.xlu0 %2586 }
 0xa87   : > { %3267 = vrsqrt.f32 %v2638_v43 }
 0xa91   : > { %v3268_v4 = vpop.eup %3267 }
 0xa92   : > { %v2646_v47 = vmul.f32 %v3268_v4, %v4156_v3 }
 0xaa8   : > { %v2581_v17 = vpop.xlane.xlu1 %2580 }
 0xaa9   : > { %v2590_v29 = vmul.f32 0.03125, %v2581_v17 }
 0xaab   : > { %v2594_v25 = vadd.f32 1e-05, %v2590_v29 }
 0xaac   : > { %v2584_v11 = vpop.xlane.xlu1 %2583 }
 0xaad   : > { %3269 = vrsqrt.f32 %v2594_v25  ;;  %v2591_v32 = vmul.f32 0.03125, %v2584_v11 }
 0xaaf   : > { %v2595_v39 = vadd.f32 1e-05, %v2591_v32 }
 0xab0   : > { %v2629_v52 = vpop.xlane.xlu1 %2628 }
 0xab1   : > { %v2635_v60 = vmul.f32 0.03125, %v2629_v52 }
 0xab3   : > { %v2639_v40 = vadd.f32 1e-05, %v2635_v60 }
 0xab5   : > { %3271 = vrsqrt.f32 %v2639_v40 }
 0xab6   : > { %3273 = vrsqrt.f32 %v2595_v39 }
 0xab7   : > { %v3270_v37 = vpop.eup %3269 }
 0xab8   : > { %v2602_v13 = vmul.f32 %v3270_v37, %v4156_v3  ;;  %v2592_v3 = vmul.f32 0.03125, %v2587_v49 }
 0xaba   : > { %v2650_v2 = vsel %vm4351_vm4, %v2602_v13, %v2646_v47  ;;  %v2596_v27 = vadd.f32 1e-05, %v2592_v3 }
 0xabb   : > { %v2661_v59 = vmul.f32 %v2874_v56, %v2650_v2 }
 0xabc   : > { %3275 = vrsqrt.f32 %v2596_v27 }
 0xabd   : > { %v2664_v44 = vpack.c.bf16 %v2661_v59, %v2660_v48 }
 0xabf   : > { %3111 = vmatprep.mubr.msk.bf16.mxu1 %vm2698_vm14, %v2664_v44  ;;  %v3272_v24 = vpop.eup %3271 }
 0xac0   : > { %v3274_v35 = vpop.eup %3273  ;;  %v2647_v30 = vmul.f32 %v3272_v24, %v4222_v45 }
 0xac1   : > { %v2603_v7 = vmul.f32 %v3274_v35, %v4222_v45 }
 0xac3   : > { %v2651_v36 = vsel %vm4352_vm0, %v2603_v7, %v2647_v30 }
 0xac4   : > { %v2662_v10 = vmul.f32 %v2874_v56, %v2651_v36 }
 0xac6   : > { %v3276_v12 = vpop.eup %3275 }
 0xac7   : > { %v2604_v31 = vmul.f32 %v3276_v12, %v4253_v20 }
 0xaf8   : > { %v2632_v22 = vpop.xlane.xlu0 %2631 }
 0xaf9   : > { %v2636_v55 = vmul.f32 0.03125, %v2632_v22 }
 0xafb   : > { %v2640_v33 = vadd.f32 1e-05, %v2636_v55 }
 0xafd   : > { %3277 = vrsqrt.f32 %v2640_v33 }
 0xb07   : > { %v3278_v6 = vpop.eup %3277 }
 0xb08   : > { %v2648_v15 = vmul.f32 %v3278_v6, %v4253_v20 }
 0xb0a   : > { %v2652_v5 = vsel %vm4353_vm1, %v2604_v31, %v2648_v15 }
 0xb0b   : > { %v2663_v14 = vmul.f32 %v2874_v56, %v2652_v5 }
 0xb0d   : > { %v2665_v50 = vpack.c.bf16 %v2663_v14, %v2662_v10 }
 0xb0f   : > { %3112 = vmatmul.mubr.msk.bf16.vlgmr.msra.gmra.mrb[52].mxu1 %vm2698_vm14, %v2665_v50 }
 0xbe2   : > { %v3113_v38 = vpop.f32.mrb[52].mxu1 }
 0xbe3   : > { %2759 = vrot.lane.b32.xlu0 %v3113_v38, %s3291_s12  ;;  %v2739_v45 = vpop.f32.mrb[53].mxu1 }
 0xbe4   : > { %v3114_v26 = vpop.f32.mrb[54].mxu1 }
 0xbe5   : > { %v2742_v8 = vpop.f32.mrb[55].mxu1 }
 0xbe6   : > { %2755 = vrot.lane.b32.xlu1 %v2742_v8, %s3293_s16 }
 0xbea   : > { %2763 = vrot.lane.b32.xlu1 %v3114_v26, %s3298_s19 }
 0xc55   : > { %v2760_v1 = vpop.permute.xlu0 %2759 }
 0xc58   : > { %v2756_v20 = vpop.permute.xlu1 %2755 }
 0xc59   : > { %v2766_v54 = vsel %vm4354_vm2, %v2739_v45, %v2756_v20 }
 0xc5a   : > { %v2767_v51 = vsel %vm2698_vm14, %v2766_v54, %v2760_v1 }
 0xc5c   : > { %v2764_v18 = vpop.permute.xlu1 %2763 }
 0xc5d   : > { %v2769_v0 = vsel %vm2768_vm3, %v2767_v51, %v2764_v18 }
 0xc5e   : > { %2770 = vst [vmem:[%s359_s23] sm:$0xff] %v2769_v0 }
 0xc5f PF: > { %s20_s13 = sadd.s32 1, %s3285_s13  }
 0xc60   : > { %p17_p5 = scmp.ge.s32.totalorder %s20_s13, 4  }
 0xc62   :  { %19 = sbr.rel (!%p17_p5) target bundleno = 1 (0x1), region = 90 }

</bundles_post_ra>
